<compile_context>
chip_gen: v5e
topology: v5e:2x2
jax: 0.10.0
libtpu: 0.0.40
codegen_flags: <defaults>
</compile_context>

<pallas_src>
import functools

import jax
import jax.numpy as jnp
from jax.experimental import pallas as pl
from jax.experimental.pallas import tpu as pltpu


QMAX = 127.0  # 8-bit symmetric
# TODO(synk): sophgo_mq's 8-bit symmetric scheme may allow qmin=-128; we keep the
# narrow symmetric range [-127, 127].

_VMEM_LIMIT = 48 * 1024 * 1024  # tiles below use only a few MiB; fits v7x's 64 MiB


def _use_int8_mxu():
    """int8 MXU path on v5e/v6e; bf16-code fallback elsewhere (v7x: fp8-only MXU)."""
    try:
        kind = jax.devices()[0].device_kind.lower()
    except Exception:  # pragma: no cover
        return False
    return ("v5" in kind) or ("v6" in kind)


_INT8_MXU = _use_int8_mxu()


def _pick_tile(dim, want, quantum):
    """Largest tile <= want that divides dim (multiple of quantum), else full dim."""
    if dim <= want:
        return dim
    t = (want // quantum) * quantum
    while t >= quantum:
        if dim % t == 0:
            return t
        t -= quantum
    # TODO(synk): pad ragged dims instead of falling back to the full extent.
    return dim


# ----------------------------------------------------------------------------
# Kernel 1: tiled quantized matmul   out = (x_codes @ w_codes) * (s_a*s_w) [+b][relu]
# Activation codes are pre-quantized outside the kernel.
# ----------------------------------------------------------------------------
def _qmm_kernel(*refs, relu, has_bias, int_mxu):
    if has_bias:
        scale_ref, x_ref, w_ref, b_ref = refs[:4]
        rest = refs[4:]
    else:
        scale_ref, x_ref, w_ref = refs[:3]
        b_ref = None
        rest = refs[3:]
    out_ref = rest[0]
    acc_ref = rest[1] if int_mxu else None

    k = pl.program_id(2)
    last_k = k == pl.num_programs(2) - 1

    if int_mxu:
        # Native int8 MXU path (v5e/v6e): exact int32 accumulation.
        @pl.when(k == 0)
        def _init():
            acc_ref[...] = jnp.zeros_like(acc_ref)

        acc_ref[...] += jnp.dot(x_ref[...], w_ref[...],
                                preferred_element_type=jnp.int32)

        @pl.when(last_k)
        def _finalize():
            out = acc_ref[...].astype(jnp.float32) * scale_ref[0]
            if has_bias:
                out = out + b_ref[...]
            if relu:
                out = jnp.maximum(out, 0.0)
            out_ref[...] = out.astype(out_ref.dtype)
    else:
        # bf16-code path (v7x / other): accumulate f32 directly into the resident
        # f32 output tile (no accumulator scratch).  int8->bf16 weight cast is exact.
        @pl.when(k == 0)
        def _init():
            out_ref[...] = jnp.zeros_like(out_ref)

        out_ref[...] += jnp.dot(x_ref[...], w_ref[...].astype(jnp.bfloat16),
                                preferred_element_type=jnp.float32)

        @pl.when(last_k)
        def _finalize():
            out = out_ref[...] * scale_ref[0]
            if has_bias:
                out = out + b_ref[...]
            if relu:
                out = jnp.maximum(out, 0.0)
            out_ref[...] = out


def _qmatmul(x_codes, w_codes, dequant_scale, bias=None, relu=False,
             tm=512, tn=512, tk=1024, int_mxu=False):
    """x_codes: (M,K) int8/bf16, w_codes: (K,N) int8, dequant_scale: (1,) f32."""
    m, k = x_codes.shape
    k2, n = w_codes.shape
    assert k == k2
    tm = _pick_tile(m, tm, 32)
    tn = _pick_tile(n, tn, 128)
    tk = _pick_tile(k, tk, 128)

    kernel = functools.partial(_qmm_kernel, relu=relu, has_bias=bias is not None,
                               int_mxu=int_mxu)
    in_specs = [
        pl.BlockSpec(memory_space=pltpu.MemorySpace.SMEM),       # (1,) dequant scale
        pl.BlockSpec((tm, tk), lambda i, j, kk: (i, kk)),        # activation codes
        pl.BlockSpec((tk, tn), lambda i, j, kk: (kk, j)),        # int8 weight codes
    ]
    args = [dequant_scale, x_codes, w_codes]
    if bias is not None:
        in_specs.append(pl.BlockSpec((1, tn), lambda i, j, kk: (0, j)))
        args.append(bias)

    scratch = [pltpu.VMEM((tm, tn), jnp.int32)] if int_mxu else []

    return pl.pallas_call(
        kernel,
        out_shape=jax.ShapeDtypeStruct((m, n), jnp.float32),
        grid=(m // tm, n // tn, k // tk),
        in_specs=in_specs,
        out_specs=pl.BlockSpec((tm, tn), lambda i, j, kk: (i, j)),
        scratch_shapes=scratch,
        compiler_params=pltpu.CompilerParams(
            dimension_semantics=("parallel", "parallel", "arbitrary"),
            vmem_limit_bytes=_VMEM_LIMIT,
        ),
    )(*args)


# ----------------------------------------------------------------------------
# Kernel 2: LM-head matmul FUSED with shifted-token cross-entropy.
# grid = (M/tm, V/tn, K/tk).  For each row tile i: accumulate the logits tile over
# k, dequant + write it at the last k, and fold it into an online log-sum-exp /
# label-logit running state across the vocab (j) axis.  At the last (j,k) the
# per-row loss is emitted; the big logits tensor is never re-read from HBM.
# ----------------------------------------------------------------------------
def _lmhead_ce_kernel(*refs, int_mxu, tn):
    if int_mxu:
        (scale_ref, x_ref, w_ref, lbl_ref,
         logits_ref, loss_ref, acc_ref, m_scr, l_scr, ll_scr) = refs
    else:
        (scale_ref, x_ref, w_ref, lbl_ref,
         logits_ref, loss_ref, m_scr, l_scr, ll_scr) = refs
        acc_ref = None

    j = pl.program_id(1)
    k = pl.program_id(2)
    nj = pl.num_programs(1)
    nk = pl.num_programs(2)

    # ---- init the online-LSE state at the start of each row tile ----
    @pl.when((j == 0) & (k == 0))
    def _init_lse():
        m_scr[...] = jnp.full_like(m_scr, -jnp.inf)
        l_scr[...] = jnp.zeros_like(l_scr)
        ll_scr[...] = jnp.zeros_like(ll_scr)

    # ---- matmul accumulation over k ----
    if int_mxu:
        @pl.when(k == 0)
        def _init_acc():
            acc_ref[...] = jnp.zeros_like(acc_ref)

        acc_ref[...] += jnp.dot(x_ref[...], w_ref[...],
                                preferred_element_type=jnp.int32)
    else:
        @pl.when(k == 0)
        def _init_acc():
            logits_ref[...] = jnp.zeros_like(logits_ref)

        logits_ref[...] += jnp.dot(x_ref[...], w_ref[...].astype(jnp.bfloat16),
                                   preferred_element_type=jnp.float32)

    # ---- at the last k: dequant + write the logits tile, update online LSE ----
    @pl.when(k == nk - 1)
    def _tile_done():
        if int_mxu:
            logits = acc_ref[...].astype(jnp.float32) * scale_ref[0]
        else:
            logits = logits_ref[...] * scale_ref[0]
        logits_ref[...] = logits

        labels = lbl_ref[...]                                   # (tm, 1) i32
        tile_max = jnp.max(logits, axis=-1, keepdims=True)      # (tm, 1)
        m_new = jnp.maximum(m_scr[...], tile_max)
        l_scr[...] = (l_scr[...] * jnp.exp(m_scr[...] - m_new)
                      + jnp.sum(jnp.exp(logits - m_new), axis=-1, keepdims=True))
        m_scr[...] = m_new

        col = jax.lax.broadcasted_iota(jnp.int32, logits.shape, 1) + j * tn
        ll_scr[...] += jnp.sum(jnp.where(col == labels, logits, 0.0),
                               axis=-1, keepdims=True)

        # ---- per-row loss at the last vocab tile ----
        @pl.when(j == nj - 1)
        def _finalize():
            lse = m_scr[...] + jnp.log(l_scr[...])
            valid = (lbl_ref[...] >= 0).astype(jnp.float32)     # -1 = dropped token
            loss_ref[...] = (lse - ll_scr[...]) * valid


def _lmhead_ce(x_codes, w_codes, dequant_scale, shift_labels,
               tm=256, tn=1024, tk=1024, int_mxu=False):
    m, k = x_codes.shape
    k2, n = w_codes.shape
    assert k == k2
    tm = _pick_tile(m, tm, 32)
    tn = _pick_tile(n, tn, 128)
    tk = _pick_tile(k, tk, 128)

    kernel = functools.partial(_lmhead_ce_kernel, int_mxu=int_mxu, tn=tn)

    in_specs = [
        pl.BlockSpec(memory_space=pltpu.MemorySpace.SMEM),       # (1,) dequant scale
        pl.BlockSpec((tm, tk), lambda i, j, kk: (i, kk)),        # activation codes
        pl.BlockSpec((tk, tn), lambda i, j, kk: (kk, j)),        # int8 weight codes
        pl.BlockSpec((tm, 1), lambda i, j, kk: (i, 0)),          # shifted labels
    ]
    scratch = []
    if int_mxu:
        scratch.append(pltpu.VMEM((tm, tn), jnp.int32))          # int32 accumulator
    scratch += [pltpu.VMEM((tm, 1), jnp.float32),                # running max
                pltpu.VMEM((tm, 1), jnp.float32),                # running sum
                pltpu.VMEM((tm, 1), jnp.float32)]                # label logit

    logits, row_loss = pl.pallas_call(
        kernel,
        out_shape=(jax.ShapeDtypeStruct((m, n), jnp.float32),
                   jax.ShapeDtypeStruct((m, 1), jnp.float32)),
        grid=(m // tm, n // tn, k // tk),
        in_specs=in_specs,
        out_specs=(pl.BlockSpec((tm, tn), lambda i, j, kk: (i, j)),
                   pl.BlockSpec((tm, 1), lambda i, j, kk: (i, 0))),
        scratch_shapes=scratch,
        compiler_params=pltpu.CompilerParams(
            dimension_semantics=("parallel", "arbitrary", "arbitrary"),
            vmem_limit_bytes=_VMEM_LIMIT,
        ),
    )(dequant_scale, x_codes, w_codes, shift_labels)
    return logits, row_loss


# ----------------------------------------------------------------------------
# Parameters + one-time weight quantization (int8 codes + per-tensor f32 scale)
# ----------------------------------------------------------------------------
def init_params(key, vocab, hidden, max_seq):
    k0, k1, k2, k3 = jax.random.split(key, 4)
    return {
        "tok_emb": jax.random.normal(k0, (vocab, hidden), jnp.float32) * 0.02,
        "pos_emb": jax.random.normal(k1, (max_seq, hidden), jnp.float32) * 0.02,
        "w1": jax.random.normal(k2, (hidden, hidden), jnp.float32) * 0.02,
        "b1": jnp.zeros((1, hidden), jnp.float32),
        "wlm": jax.random.normal(k3, (hidden, vocab), jnp.float32) * 0.02,
    }


def prepare_quantized_params(params):
    """Pre-quantize weights ONCE (per-tensor symmetric 8-bit, int8 codes in HBM)."""
    def q(w):
        s = jnp.maximum(jnp.max(jnp.abs(w)) / QMAX, 1e-8).astype(jnp.float32)
        qw = jnp.clip(jnp.round(w / s), -QMAX, QMAX).astype(jnp.int8)
        return qw, s
    w1_q, w1_s = q(params["w1"])
    wlm_q, wlm_s = q(params["wlm"])
    return {
        "tok_emb": params["tok_emb"],
        "pos_emb": params["pos_emb"],
        "b1": params["b1"],
        "w1_q": w1_q, "w1_s": w1_s,
        "wlm_q": wlm_q, "wlm_s": wlm_s,
    }


def _quantize_activation(x, code_dtype):
    """Per-tensor symmetric activation quantization (abs-max + quantize, one pass)."""
    s = jnp.maximum(jnp.max(jnp.abs(x)) / QMAX, 1e-8).astype(jnp.float32)
    codes = jnp.clip(jnp.round(x / s), -QMAX, QMAX).astype(code_dtype)
    return codes, s


# ----------------------------------------------------------------------------
# Quantizemodel.forward equivalent
# ----------------------------------------------------------------------------
@jax.jit
def quantizemodel_forward(qparams, input_ids, attention_mask):
    # labels = input_ids (exactly as in the PyTorch module)
    labels = input_ids
    bs, sl = input_ids.shape
    vocab, hidden = qparams["tok_emb"].shape
    code_dtype = jnp.int8 if _INT8_MXU else jnp.bfloat16

    # --- embedding glue (plain JAX) ---
    # TODO(synk): attention_mask is accepted but the synthetic stand-in model has
    # no attention stack; a full-ones mask would be a no-op, so it is unused.
    h = qparams["tok_emb"][input_ids] + qparams["pos_emb"][:sl][None, :, :]
    h = h.reshape(bs * sl, hidden).astype(jnp.float32)

    # --- fake-quantized MLP (Pallas, pre-quantized activation codes) ---
    h_codes, h_s = _quantize_activation(h, code_dtype)
    h1 = _qmatmul(h_codes, qparams["w1_q"],
                  dequant_scale=jnp.reshape(h_s * qparams["w1_s"], (1,)),
                  bias=qparams["b1"], relu=True, int_mxu=_INT8_MXU)

    # TODO(synk): fuse this abs-max into the first matmul's finalize (per-tile max
    # output) to drop one small HBM read of h1.
    h1_codes, h1_s = _quantize_activation(h1, code_dtype)

    # --- shifted labels: only the tiny label array is shifted in JAX; -1 marks the
    # dropped last token of each sequence (excluded from the mean). ---
    shift_labels = jnp.concatenate(
        [labels[:, 1:], jnp.full((bs, 1), -1, labels.dtype)], axis=1
    ).reshape(bs * sl, 1).astype(jnp.int32)

    # --- Pallas: LM head fused with shifted-token cross-entropy ---
    logits_2d, row_loss = _lmhead_ce(
        h1_codes, qparams["wlm_q"],
        dequant_scale=jnp.reshape(h1_s * qparams["wlm_s"], (1,)),
        shift_labels=shift_labels, int_mxu=_INT8_MXU)

    lm_logits = logits_2d.reshape(bs, sl, vocab)
    n_valid = bs * (sl - 1)
    loss = jnp.sum(row_loss) / jnp.float32(n_valid)   # single divide (torch order)
    return loss, lm_logits


# ----------------------------------------------------------------------------
# Pure-JAX reference (same fake-quant semantics) for a sanity check
# ----------------------------------------------------------------------------
def _reference_forward(qparams, input_ids):
    labels = input_ids
    bs, sl = input_ids.shape
    vocab, hidden = qparams["tok_emb"].shape
    h = qparams["tok_emb"][input_ids] + qparams["pos_emb"][:sl][None, :, :]
    h = h.reshape(bs * sl, hidden).astype(jnp.float32)

    def fq(x):
        s = jnp.maximum(jnp.max(jnp.abs(x)) / QMAX, 1e-8)
        return jnp.clip(jnp.round(x / s), -QMAX, QMAX) * s

    w1 = qparams["w1_q"].astype(jnp.float32) * qparams["w1_s"]
    wlm = qparams["wlm_q"].astype(jnp.float32) * qparams["wlm_s"]
    h1 = jnp.maximum(fq(h) @ w1 + qparams["b1"], 0.0)
    logits = fq(h1) @ wlm
    lm_logits = logits.reshape(bs, sl, vocab)

    shift_logits = lm_logits[:, :-1, :].reshape(-1, vocab)
    shift_labels = labels[:, 1:].reshape(-1)
    mx = jnp.max(shift_logits, axis=-1)
    lse = jnp.log(jnp.sum(jnp.exp(shift_logits - mx[:, None]), axis=-1)) + mx
    ll = jnp.take_along_axis(shift_logits, shift_labels[:, None], axis=-1)[:, 0]
    loss = jnp.mean(lse - ll)
    return loss, lm_logits


if __name__ == "__main__":
    bs, sl, hidden, vocab = 2, 16, 256, 1024   # small but lane/sublane aligned

    key = jax.random.PRNGKey(0)
    kp, ki = jax.random.split(key)
    params = init_params(kp, vocab=vocab, hidden=hidden, max_seq=sl)
    qparams = prepare_quantized_params(params)

    input_ids = jax.random.randint(ki, (bs, sl), 0, vocab, dtype=jnp.int32)
    attention_mask = jnp.ones((bs, sl), dtype=jnp.int32)

    loss, lm_logits = quantizemodel_forward(qparams, input_ids, attention_mask)
    jax.block_until_ready((loss, lm_logits))

    assert lm_logits.shape == (bs, sl, vocab)
    assert loss.shape == ()
    assert bool(jnp.isfinite(loss))

    ref_loss, ref_logits = _reference_forward(qparams, input_ids)
    assert bool(jnp.allclose(lm_logits, ref_logits, atol=5e-4, rtol=1e-3)), \
        float(jnp.max(jnp.abs(lm_logits - ref_logits)))
    assert abs(float(loss) - float(ref_loss)) < 1e-3, (float(loss), float(ref_loss))

    print("KERNEL_OK")
</pallas_src>

<mosaic_0001>
module attributes {stable_mosaic.version = 11 : i64} {
  func.func @_qmm_kernel(%arg0: i32, %arg1: i32, %arg2: i32, %arg3: memref<1xf32, #tpu.memory_space<smem>>, %arg4: memref<32x256xbf16, #tpu.memory_space<vmem>>, %arg5: memref<256x256xi8, #tpu.memory_space<vmem>>, %arg6: memref<1x256xf32, #tpu.memory_space<vmem>>, %arg7: memref<32x256xf32, #tpu.memory_space<vmem>>) attributes {dimension_semantics = [#tpu.dimension_semantics<parallel>, #tpu.dimension_semantics<parallel>, #tpu.dimension_semantics<arbitrary>], iteration_bounds = array<i64: 1, 1, 1>, scalar_prefetch = 0 : i64, scratch_operands = 0 : i64, tpu.core_type = #tpu.core_type<tc>, window_params = [{transform_indices = @transform_0, window_bounds = array<i64: 1>}, {transform_indices = @transform_1, window_bounds = array<i64: 32, 256>}, {transform_indices = @transform_2, window_bounds = array<i64: 256, 256>}, {transform_indices = @transform_3, window_bounds = array<i64: 1, 256>}, {transform_indices = @transform_4, window_bounds = array<i64: 32, 256>}]} {
    %c0_i32 = arith.constant 0 : i32
    %0 = arith.cmpi eq, %arg2, %c0_i32 : i32
    %c0_i32_0 = arith.constant 0 : i32
    %1 = arith.cmpi eq, %arg2, %c0_i32_0 : i32
    %2 = arith.extui %1 : i1 to i32
    %c0_i32_1 = arith.constant 0 : i32
    %3 = arith.cmpi ne, %2, %c0_i32_1 : i32
    scf.if %3 {
      %cst_10 = arith.constant 0.000000e+00 : f32
      %13 = vector.broadcast %cst_10 : f32 to vector<32x256xf32>
      %c0_11 = arith.constant 0 : index
      %c0_12 = arith.constant 0 : index
      %14 = vector.load %arg7[%c0_11, %c0_12] : memref<32x256xf32, #tpu.memory_space<vmem>>, vector<32x256xf32>
      tpu.vector_store %arg7[%c0_11, %c0_12], %13 {strides = array<i32>} : memref<32x256xf32, #tpu.memory_space<vmem>>, vector<32x256xf32>,
    } else {
    }
    %c0 = arith.constant 0 : index
    %c0_2 = arith.constant 0 : index
    %4 = vector.load %arg7[%c0, %c0_2] : memref<32x256xf32, #tpu.memory_space<vmem>>, vector<32x256xf32>
    %c0_3 = arith.constant 0 : index
    %c0_4 = arith.constant 0 : index
    %5 = vector.load %arg4[%c0_3, %c0_4] : memref<32x256xbf16, #tpu.memory_space<vmem>>, vector<32x256xbf16>
    %c0_5 = arith.constant 0 : index
    %c0_6 = arith.constant 0 : index
    %6 = vector.load %arg5[%c0_5, %c0_6] : memref<256x256xi8, #tpu.memory_space<vmem>>, vector<256x256xi8>
    %7 = arith.sitofp %6 : vector<256x256xi8> to vector<256x256xbf16>
    %cst = arith.constant dense<0.000000e+00> : vector<32x256xf32>
    %8 = tpu.matmul %5, %7, %cst {dimension_numbers = #tpu.dot_dimension_numbers<[1], [0], [0], [1], [0, 0, 1, 1], [], []>} : vector<32x256xbf16>, vector<256x256xbf16>, vector<32x256xf32> -> vector<32x256xf32>
    %9 = arith.addf %4, %8 : vector<32x256xf32>
    %c0_7 = arith.constant 0 : index
    %c0_8 = arith.constant 0 : index
    %10 = vector.load %arg7[%c0_7, %c0_8] : memref<32x256xf32, #tpu.memory_space<vmem>>, vector<32x256xf32>
    tpu.vector_store %arg7[%c0_7, %c0_8], %9 {strides = array<i32>} : memref<32x256xf32, #tpu.memory_space<vmem>>, vector<32x256xf32>,
    %11 = arith.extui %0 : i1 to i32
    %c0_i32_9 = arith.constant 0 : i32
    %12 = arith.cmpi ne, %11, %c0_i32_9 : i32
    scf.if %12 {
      %c0_10 = arith.constant 0 : index
      %c0_11 = arith.constant 0 : index
      %13 = vector.load %arg7[%c0_10, %c0_11] : memref<32x256xf32, #tpu.memory_space<vmem>>, vector<32x256xf32>
      %c0_12 = arith.constant 0 : index
      %14 = memref.load %arg3[%c0_12] : memref<1xf32, #tpu.memory_space<smem>>
      %15 = vector.broadcast %14 : f32 to vector<32x256xf32>
      %16 = arith.mulf %13, %15 : vector<32x256xf32>
      %c0_13 = arith.constant 0 : index
      %c0_14 = arith.constant 0 : index
      %17 = vector.load %arg6[%c0_13, %c0_14] : memref<1x256xf32, #tpu.memory_space<vmem>>, vector<1x256xf32>
      %18 = vector.broadcast %17 : vector<1x256xf32> to vector<32x256xf32>
      %19 = arith.addf %16, %18 : vector<32x256xf32>
      %cst_15 = arith.constant 0.000000e+00 : f32
      %20 = vector.broadcast %cst_15 : f32 to vector<32x256xf32>
      %21 = arith.maximumf %19, %20 : vector<32x256xf32>
      %c0_16 = arith.constant 0 : index
      %c0_17 = arith.constant 0 : index
      %22 = vector.load %arg7[%c0_16, %c0_17] : memref<32x256xf32, #tpu.memory_space<vmem>>, vector<32x256xf32>
      tpu.vector_store %arg7[%c0_16, %c0_17], %21 {strides = array<i32>} : memref<32x256xf32, #tpu.memory_space<vmem>>, vector<32x256xf32>,
    } else {
    }
    return
  }
  func.func @transform_0(%arg0: i32, %arg1: i32, %arg2: i32) -> i32 {
    %c0_i32 = arith.constant 0 : i32
    %c0_i32_0 = arith.constant 0 : i32
    return %c0_i32 : i32
  }
  func.func @transform_1(%arg0: i32, %arg1: i32, %arg2: i32) -> (i32, i32) {
    %c0_i32 = arith.constant 0 : i32
    return %arg0, %arg2 : i32, i32
  }
  func.func @transform_2(%arg0: i32, %arg1: i32, %arg2: i32) -> (i32, i32) {
    %c0_i32 = arith.constant 0 : i32
    return %arg2, %arg1 : i32, i32
  }
  func.func @transform_3(%arg0: i32, %arg1: i32, %arg2: i32) -> (i32, i32) {
    %c0_i32 = arith.constant 0 : i32
    %c0_i32_0 = arith.constant 0 : i32
    return %c0_i32, %arg1 : i32, i32
  }
  func.func @transform_4(%arg0: i32, %arg1: i32, %arg2: i32) -> (i32, i32) {
    %c0_i32 = arith.constant 0 : i32
    return %arg0, %arg1 : i32, i32
  }
}

module attributes {stable_mosaic.version = 11 : i64} {
  func.func @_lmhead_ce_kernel(%arg0: i32, %arg1: i32, %arg2: i32, %arg3: memref<1xf32, #tpu.memory_space<smem>>, %arg4: memref<32x256xbf16, #tpu.memory_space<vmem>>, %arg5: memref<256x1024xi8, #tpu.memory_space<vmem>>, %arg6: memref<32x1xi32, #tpu.memory_space<vmem>>, %arg7: memref<32x1024xf32, #tpu.memory_space<vmem>>, %arg8: memref<32x1xf32, #tpu.memory_space<vmem>>, %arg9: memref<32x1xf32, #tpu.memory_space<vmem>>, %arg10: memref<32x1xf32, #tpu.memory_space<vmem>>, %arg11: memref<32x1xf32, #tpu.memory_space<vmem>>) attributes {dimension_semantics = [#tpu.dimension_semantics<parallel>, #tpu.dimension_semantics<arbitrary>, #tpu.dimension_semantics<arbitrary>], iteration_bounds = array<i64: 1, 1, 1>, scalar_prefetch = 0 : i64, scratch_operands = 3 : i64, tpu.core_type = #tpu.core_type<tc>, window_params = [{transform_indices = @transform_0, window_bounds = array<i64: 1>}, {transform_indices = @transform_1, window_bounds = array<i64: 32, 256>}, {transform_indices = @transform_2, window_bounds = array<i64: 256, 1024>}, {transform_indices = @transform_3, window_bounds = array<i64: 32, 1>}, {transform_indices = @transform_4, window_bounds = array<i64: 32, 1024>}, {transform_indices = @transform_5, window_bounds = array<i64: 32, 1>}]} {
    %c0_i32 = arith.constant 0 : i32
    %0 = arith.cmpi eq, %arg1, %c0_i32 : i32
    %c0_i32_0 = arith.constant 0 : i32
    %1 = arith.cmpi eq, %arg2, %c0_i32_0 : i32
    %2 = arith.andi %0, %1 : i1
    %3 = arith.extui %2 : i1 to i32
    %c0_i32_1 = arith.constant 0 : i32
    %4 = arith.cmpi ne, %3, %c0_i32_1 : i32
    scf.if %4 {
      %cst_13 = arith.constant 0xFF800000 : f32
      %18 = vector.broadcast %cst_13 : f32 to vector<32x1xf32>
      %c0_14 = arith.constant 0 : index
      %c0_15 = arith.constant 0 : index
      %19 = vector.load %arg9[%c0_14, %c0_15] : memref<32x1xf32, #tpu.memory_space<vmem>>, vector<32x1xf32>
      tpu.vector_store %arg9[%c0_14, %c0_15], %18 {strides = array<i32>} : memref<32x1xf32, #tpu.memory_space<vmem>>, vector<32x1xf32>,
      %cst_16 = arith.constant 0.000000e+00 : f32
      %20 = vector.broadcast %cst_16 : f32 to vector<32x1xf32>
      %c0_17 = arith.constant 0 : index
      %c0_18 = arith.constant 0 : index
      %21 = vector.load %arg10[%c0_17, %c0_18] : memref<32x1xf32, #tpu.memory_space<vmem>>, vector<32x1xf32>
      tpu.vector_store %arg10[%c0_17, %c0_18], %20 {strides = array<i32>} : memref<32x1xf32, #tpu.memory_space<vmem>>, vector<32x1xf32>,
      %cst_19 = arith.constant 0.000000e+00 : f32
      %22 = vector.broadcast %cst_19 : f32 to vector<32x1xf32>
      %c0_20 = arith.constant 0 : index
      %c0_21 = arith.constant 0 : index
      %23 = vector.load %arg11[%c0_20, %c0_21] : memref<32x1xf32, #tpu.memory_space<vmem>>, vector<32x1xf32>
      tpu.vector_store %arg11[%c0_20, %c0_21], %22 {strides = array<i32>} : memref<32x1xf32, #tpu.memory_space<vmem>>, vector<32x1xf32>,
    } else {
    }
    %c0_i32_2 = arith.constant 0 : i32
    %5 = arith.cmpi eq, %arg2, %c0_i32_2 : i32
    %6 = arith.extui %5 : i1 to i32
    %c0_i32_3 = arith.constant 0 : i32
    %7 = arith.cmpi ne, %6, %c0_i32_3 : i32
    scf.if %7 {
      %cst_13 = arith.constant 0.000000e+00 : f32
      %18 = vector.broadcast %cst_13 : f32 to vector<32x1024xf32>
      %c0_14 = arith.constant 0 : index
      %c0_15 = arith.constant 0 : index
      %19 = vector.load %arg7[%c0_14, %c0_15] : memref<32x1024xf32, #tpu.memory_space<vmem>>, vector<32x1024xf32>
      tpu.vector_store %arg7[%c0_14, %c0_15], %18 {strides = array<i32>} : memref<32x1024xf32, #tpu.memory_space<vmem>>, vector<32x1024xf32>,
    } else {
    }
    %c0 = arith.constant 0 : index
    %c0_4 = arith.constant 0 : index
    %8 = vector.load %arg7[%c0, %c0_4] : memref<32x1024xf32, #tpu.memory_space<vmem>>, vector<32x1024xf32>
    %c0_5 = arith.constant 0 : index
    %c0_6 = arith.constant 0 : index
    %9 = vector.load %arg4[%c0_5, %c0_6] : memref<32x256xbf16, #tpu.memory_space<vmem>>, vector<32x256xbf16>
    %c0_7 = arith.constant 0 : index
    %c0_8 = arith.constant 0 : index
    %10 = vector.load %arg5[%c0_7, %c0_8] : memref<256x1024xi8, #tpu.memory_space<vmem>>, vector<256x1024xi8>
    %11 = arith.sitofp %10 : vector<256x1024xi8> to vector<256x1024xbf16>
    %cst = arith.constant dense<0.000000e+00> : vector<32x1024xf32>
    %12 = tpu.matmul %9, %11, %cst {dimension_numbers = #tpu.dot_dimension_numbers<[1], [0], [0], [1], [0, 0, 1, 1], [], []>} : vector<32x256xbf16>, vector<256x1024xbf16>, vector<32x1024xf32> -> vector<32x1024xf32>
    %13 = arith.addf %8, %12 : vector<32x1024xf32>
    %c0_9 = arith.constant 0 : index
    %c0_10 = arith.constant 0 : index
    %14 = vector.load %arg7[%c0_9, %c0_10] : memref<32x1024xf32, #tpu.memory_space<vmem>>, vector<32x1024xf32>
    tpu.vector_store %arg7[%c0_9, %c0_10], %13 {strides = array<i32>} : memref<32x1024xf32, #tpu.memory_space<vmem>>, vector<32x1024xf32>,
    %c0_i32_11 = arith.constant 0 : i32
    %15 = arith.cmpi eq, %arg2, %c0_i32_11 : i32
    %16 = arith.extui %15 : i1 to i32
    %c0_i32_12 = arith.constant 0 : i32
    %17 = arith.cmpi ne, %16, %c0_i32_12 : i32
    scf.if %17 {
      %c0_13 = arith.constant 0 : index
      %c0_14 = arith.constant 0 : index
      %18 = vector.load %arg7[%c0_13, %c0_14] : memref<32x1024xf32, #tpu.memory_space<vmem>>, vector<32x1024xf32>
      %c0_15 = arith.constant 0 : index
      %19 = memref.load %arg3[%c0_15] : memref<1xf32, #tpu.memory_space<smem>>
      %20 = vector.broadcast %19 : f32 to vector<32x1024xf32>
      %21 = arith.mulf %18, %20 : vector<32x1024xf32>
      %c0_16 = arith.constant 0 : index
      %c0_17 = arith.constant 0 : index
      %22 = vector.load %arg7[%c0_16, %c0_17] : memref<32x1024xf32, #tpu.memory_space<vmem>>, vector<32x1024xf32>
      tpu.vector_store %arg7[%c0_16, %c0_17], %21 {strides = array<i32>} : memref<32x1024xf32, #tpu.memory_space<vmem>>, vector<32x1024xf32>,
      %c0_18 = arith.constant 0 : index
      %c0_19 = arith.constant 0 : index
      %23 = vector.load %arg6[%c0_18, %c0_19] : memref<32x1xi32, #tpu.memory_space<vmem>>, vector<32x1xi32>
      %cst_20 = arith.constant dense<0xFF800000> : vector<32xf32>
      %24 = vector.multi_reduction <maximumf>, %21, %cst_20 [1] : vector<32x1024xf32> to vector<32xf32>
      %25 = vector.shape_cast %24 : vector<32xf32> to vector<32x1xf32>
      %c0_21 = arith.constant 0 : index
      %c0_22 = arith.constant 0 : index
      %26 = vector.load %arg9[%c0_21, %c0_22] : memref<32x1xf32, #tpu.memory_space<vmem>>, vector<32x1xf32>
      %27 = arith.maximumf %26, %25 : vector<32x1xf32>
      %c0_23 = arith.constant 0 : index
      %c0_24 = arith.constant 0 : index
      %28 = vector.load %arg10[%c0_23, %c0_24] : memref<32x1xf32, #tpu.memory_space<vmem>>, vector<32x1xf32>
      %c0_25 = arith.constant 0 : index
      %c0_26 = arith.constant 0 : index
      %29 = vector.load %arg9[%c0_25, %c0_26] : memref<32x1xf32, #tpu.memory_space<vmem>>, vector<32x1xf32>
      %30 = arith.subf %29, %27 : vector<32x1xf32>
      %31 = math.exp %30 : vector<32x1xf32>
      %32 = arith.mulf %28, %31 : vector<32x1xf32>
      %33 = vector.broadcast %27 : vector<32x1xf32> to vector<32x1024xf32>
      %34 = arith.subf %21, %33 : vector<32x1024xf32>
      %35 = math.exp %34 : vector<32x1024xf32>
      %cst_27 = arith.constant dense<0.000000e+00> : vector<32xf32>
      %36 = vector.multi_reduction <add>, %35, %cst_27 [1] : vector<32x1024xf32> to vector<32xf32>
      %37 = vector.shape_cast %36 : vector<32xf32> to vector<32x1xf32>
      %38 = arith.addf %32, %37 : vector<32x1xf32>
      %c0_28 = arith.constant 0 : index
      %c0_29 = arith.constant 0 : index
      %39 = vector.load %arg10[%c0_28, %c0_29] : memref<32x1xf32, #tpu.memory_space<vmem>>, vector<32x1xf32>
      tpu.vector_store %arg10[%c0_28, %c0_29], %38 {strides = array<i32>} : memref<32x1xf32, #tpu.memory_space<vmem>>, vector<32x1xf32>,
      %c0_30 = arith.constant 0 : index
      %c0_31 = arith.constant 0 : index
      %40 = vector.load %arg9[%c0_30, %c0_31] : memref<32x1xf32, #tpu.memory_space<vmem>>, vector<32x1xf32>
      tpu.vector_store %arg9[%c0_30, %c0_31], %27 {strides = array<i32>} : memref<32x1xf32, #tpu.memory_space<vmem>>, vector<32x1xf32>,
      %41 = tpu.iota {dimensions = array<i32: 1>} : vector<32x1024xi32>
      %c1024_i32 = arith.constant 1024 : i32
      %42 = arith.muli %arg1, %c1024_i32 : i32
      %43 = vector.broadcast %42 : i32 to vector<32x1024xi32>
      %44 = arith.addi %41, %43 : vector<32x1024xi32>
      %c0_32 = arith.constant 0 : index
      %c0_33 = arith.constant 0 : index
      %45 = vector.load %arg11[%c0_32, %c0_33] : memref<32x1xf32, #tpu.memory_space<vmem>>, vector<32x1xf32>
      %46 = vector.broadcast %23 : vector<32x1xi32> to vector<32x1024xi32>
      %47 = arith.cmpi eq, %44, %46 : vector<32x1024xi32>
      %cst_34 = arith.constant 0.000000e+00 : f32
      %48 = vector.broadcast %cst_34 : f32 to vector<32x1024xf32>
      %49 = arith.select %47, %21, %48 : vector<32x1024xi1>, vector<32x1024xf32>
      %cst_35 = arith.constant dense<0.000000e+00> : vector<32xf32>
      %50 = vector.multi_reduction <add>, %49, %cst_35 [1] : vector<32x1024xf32> to vector<32xf32>
      %51 = vector.shape_cast %50 : vector<32xf32> to vector<32x1xf32>
      %52 = arith.addf %45, %51 : vector<32x1xf32>
      %c0_36 = arith.constant 0 : index
      %c0_37 = arith.constant 0 : index
      %53 = vector.load %arg11[%c0_36, %c0_37] : memref<32x1xf32, #tpu.memory_space<vmem>>, vector<32x1xf32>
      tpu.vector_store %arg11[%c0_36, %c0_37], %52 {strides = array<i32>} : memref<32x1xf32, #tpu.memory_space<vmem>>, vector<32x1xf32>,
      %c0_i32_38 = arith.constant 0 : i32
      %54 = arith.cmpi eq, %arg1, %c0_i32_38 : i32
      %55 = arith.extui %54 : i1 to i32
      %c0_i32_39 = arith.constant 0 : i32
      %56 = arith.cmpi ne, %55, %c0_i32_39 : i32
      scf.if %56 {
        %c0_40 = arith.constant 0 : index
        %c0_41 = arith.constant 0 : index
        %57 = vector.load %arg9[%c0_40, %c0_41] : memref<32x1xf32, #tpu.memory_space<vmem>>, vector<32x1xf32>
        %c0_42 = arith.constant 0 : index
        %c0_43 = arith.constant 0 : index
        %58 = vector.load %arg10[%c0_42, %c0_43] : memref<32x1xf32, #tpu.memory_space<vmem>>, vector<32x1xf32>
        %59 = math.log %58 : vector<32x1xf32>
        %60 = arith.addf %57, %59 : vector<32x1xf32>
        %c0_44 = arith.constant 0 : index
        %c0_45 = arith.constant 0 : index
        %61 = vector.load %arg6[%c0_44, %c0_45] : memref<32x1xi32, #tpu.memory_space<vmem>>, vector<32x1xi32>
        %c0_i32_46 = arith.constant 0 : i32
        %62 = vector.broadcast %c0_i32_46 : i32 to vector<32x1xi32>
        %63 = arith.cmpi sge, %61, %62 : vector<32x1xi32>
        %64 = arith.extui %63 : vector<32x1xi1> to vector<32x1xi32>
        %65 = arith.sitofp %64 : vector<32x1xi32> to vector<32x1xf32>
        %c0_47 = arith.constant 0 : index
        %c0_48 = arith.constant 0 : index
        %66 = vector.load %arg11[%c0_47, %c0_48] : memref<32x1xf32, #tpu.memory_space<vmem>>, vector<32x1xf32>
        %67 = arith.subf %60, %66 : vector<32x1xf32>
        %68 = arith.mulf %67, %65 : vector<32x1xf32>
        %c0_49 = arith.constant 0 : index
        %c0_50 = arith.constant 0 : index
        %69 = vector.load %arg8[%c0_49, %c0_50] : memref<32x1xf32, #tpu.memory_space<vmem>>, vector<32x1xf32>
        tpu.vector_store %arg8[%c0_49, %c0_50], %68 {strides = array<i32>} : memref<32x1xf32, #tpu.memory_space<vmem>>, vector<32x1xf32>,
      } else {
      }
    } else {
    }
    return
  }
  func.func @transform_0(%arg0: i32, %arg1: i32, %arg2: i32) -> i32 {
    %c0_i32 = arith.constant 0 : i32
    %c0_i32_0 = arith.constant 0 : i32
    return %c0_i32 : i32
  }
  func.func @transform_1(%arg0: i32, %arg1: i32, %arg2: i32) -> (i32, i32) {
    %c0_i32 = arith.constant 0 : i32
    return %arg0, %arg2 : i32, i32
  }
  func.func @transform_2(%arg0: i32, %arg1: i32, %arg2: i32) -> (i32, i32) {
    %c0_i32 = arith.constant 0 : i32
    return %arg2, %arg1 : i32, i32
  }
  func.func @transform_3(%arg0: i32, %arg1: i32, %arg2: i32) -> (i32, i32) {
    %c0_i32 = arith.constant 0 : i32
    %c0_i32_0 = arith.constant 0 : i32
    return %arg0, %c0_i32 : i32, i32
  }
  func.func @transform_4(%arg0: i32, %arg1: i32, %arg2: i32) -> (i32, i32) {
    %c0_i32 = arith.constant 0 : i32
    return %arg0, %arg1 : i32, i32
  }
  func.func @transform_5(%arg0: i32, %arg1: i32, %arg2: i32) -> (i32, i32) {
    %c0_i32 = arith.constant 0 : i32
    %c0_i32_0 = arith.constant 0 : i32
    return %arg0, %c0_i32 : i32, i32
  }
}

</mosaic_0001>

<bundles_post_ra>
// kernel: quantizemodel_forward.2
= control target key start
LH: loop header
LB: loop body
LE: loop exit
PB: predicated region body
PF: predicated region fallthrough
CT: control target
= control target key end

     0   :  { %s533_s2 = inlined_call_operand.vmem [shape: s8[256,256], index: 2, kind: input, shape index: {}]   ;;  %s534_s1 = inlined_call_operand.vmem [shape: bf16[32,256], index: 1, kind: input, shape index: {}]   ;;  %s535_s3 = inlined_call_operand.vmem [shape: f32[1,256], index: 3, kind: input, shape index: {}]   ;;  %s536_s0 = inlined_call_operand.<no memory space> [shape: f32[1], index: 0, kind: input, shape index: {}]   ;;  %s537_s4 = inlined_call_operand.vmem [shape: f32[32,256], index: 4, kind: output, shape index: {}]  }
   0x1   :  { %v48_v0 = vld [vmem:[%s533_s2 + $0x30] sm:$0xff]  ;;  %v49_v2 = vld [vmem:[%s533_s2 + $0x38] sm:$0xff]  ;;  %v46_v28 = vld [vmem:[%s533_s2 + $0x20] sm:$0xff] }
   0x2   :  { %v56_v1 = vld [vmem:[%s533_s2 + $0x70] sm:$0xff]  ;;  %v86_v3 = vunpack.c.2.s8 %v48_v0  ;;  %v88_v4 = vunpack.c.3.s8 %v48_v0  ;;  %v57_v7 = vld [vmem:[%s533_s2 + $0x78] sm:$0xff]  ;;  %v87_v8 = vunpack.c.2.s8 %v49_v2  ;;  %v89_v9 = vunpack.c.3.s8 %v49_v2  ;;  %v54_v37 = vld [vmem:[%s533_s2 + $0x60] sm:$0xff] }
   0x3   :  { %v118_v5 = vunpack.c.2.s8 %v56_v1  ;;  %v120_v6 = vunpack.c.3.s8 %v56_v1  ;;  %v119_v10 = vunpack.c.2.s8 %v57_v7  ;;  %v121_v11 = vunpack.c.3.s8 %v57_v7  ;;  %v47_v42 = vld [vmem:[%s533_s2 + $0x28] sm:$0xff] }
   0x4   :  { %v150_v12 = vcvt.s32.f32 %v86_v3  ;;  %v152_v13 = vcvt.s32.f32 %v88_v4  ;;  %v151_v16 = vcvt.s32.f32 %v87_v8  ;;  %v153_v17 = vcvt.s32.f32 %v89_v9  ;;  %v55_v47 = vld [vmem:[%s533_s2 + $0x68] sm:$0xff]  ;;  %v44_v8 = vld [vmem:[%s533_s2 + $0x10] sm:$0xff] }
   0x5   :  { %v182_v14 = vcvt.s32.f32 %v118_v5  ;;  %v184_v15 = vcvt.s32.f32 %v120_v6  ;;  %v183_v18 = vcvt.s32.f32 %v119_v10  ;;  %v185_v19 = vcvt.s32.f32 %v121_v11 }
   0x6   :  { %v200_v20 = vpack.c.bf16 %v152_v13, %v150_v12  ;;  %v82_v22 = vunpack.c.0.s8 %v48_v0  ;;  %v84_v23 = vunpack.c.1.s8 %v48_v0  ;;  %v201_v24 = vpack.c.bf16 %v153_v17, %v151_v16  ;;  %v52_v17 = vld [vmem:[%s533_s2 + $0x50] sm:$0xff] }
   0x7   :  { %v216_v21 = vpack.c.bf16 %v184_v15, %v182_v14  ;;  %v217_v25 = vpack.c.bf16 %v185_v19, %v183_v18  ;;  %v114_v26 = vunpack.c.0.s8 %v56_v1  ;;  %v116_v27 = vunpack.c.1.s8 %v56_v1 }
   0x8   :  { %238 = vmatpush.bf16.msra.mxu0 %v200_v20  ;;  %v146_v29 = vcvt.s32.f32 %v82_v22  ;;  %v148_v30 = vcvt.s32.f32 %v84_v23  ;;  %v83_v31 = vunpack.c.0.s8 %v49_v2  ;;  %v85_v32 = vunpack.c.1.s8 %v49_v2  ;;  %276 = vmatpush.bf16.msra.mxu2 %v201_v24  ;;  %v45_v22 = vld [vmem:[%s533_s2 + $0x18] sm:$0xff] }
   0x9   :  { %257 = vmatpush.bf16.msra.mxu1 %v216_v21  ;;  %295 = vmatpush.bf16.msra.mxu3 %v217_v25  ;;  %v178_v33 = vcvt.s32.f32 %v114_v26  ;;  %v180_v34 = vcvt.s32.f32 %v116_v27  ;;  %v115_v35 = vunpack.c.0.s8 %v57_v7  ;;  %v117_v36 = vunpack.c.1.s8 %v57_v7  ;;  %v53_v27 = vld [vmem:[%s533_s2 + $0x58] sm:$0xff] }
   0xa   :  { %v198_v38 = vpack.c.bf16 %v148_v30, %v146_v29  ;;  %v147_v39 = vcvt.s32.f32 %v83_v31  ;;  %v149_v40 = vcvt.s32.f32 %v85_v32  ;;  %v78_v41 = vunpack.c.2.s8 %v46_v28 }
   0xb   :  { %v214_v43 = vpack.c.bf16 %v180_v34, %v178_v33  ;;  %v179_v44 = vcvt.s32.f32 %v115_v35  ;;  %v181_v45 = vcvt.s32.f32 %v117_v36  ;;  %v80_v46 = vunpack.c.3.s8 %v46_v28 }
   0xc   :  { %239 = vmatpush.bf16.msra.mxu0 %v198_v38  ;;  %v199_v48 = vpack.c.bf16 %v149_v40, %v147_v39  ;;  %v142_v49 = vcvt.s32.f32 %v78_v41  ;;  %v110_v50 = vunpack.c.2.s8 %v54_v37  ;;  %v112_v51 = vunpack.c.3.s8 %v54_v37 }
   0xd   :  { %258 = vmatpush.bf16.msra.mxu1 %v214_v43  ;;  %v215_v52 = vpack.c.bf16 %v181_v45, %v179_v44  ;;  %v144_v53 = vcvt.s32.f32 %v80_v46  ;;  %v79_v54 = vunpack.c.2.s8 %v47_v42  ;;  %v81_v55 = vunpack.c.3.s8 %v47_v42 }
   0xe   :  { %277 = vmatpush.bf16.msra.mxu2 %v199_v48  ;;  %v174_v56 = vcvt.s32.f32 %v110_v50  ;;  %v176_v57 = vcvt.s32.f32 %v112_v51  ;;  %v111_v58 = vunpack.c.2.s8 %v55_v47  ;;  %v113_v59 = vunpack.c.3.s8 %v55_v47 }
   0xf   :  { %296 = vmatpush.bf16.msra.mxu3 %v215_v52  ;;  %v196_v60 = vpack.c.bf16 %v144_v53, %v142_v49  ;;  %v143_v61 = vcvt.s32.f32 %v79_v54  ;;  %v145_v62 = vcvt.s32.f32 %v81_v55  ;;  %v74_v63 = vunpack.c.0.s8 %v46_v28  ;;  %v42_v52 = vld [vmem:[%s533_s2] sm:$0xff] }
  0x10   :  { %v212_v0 = vpack.c.bf16 %v176_v57, %v174_v56  ;;  %v175_v1 = vcvt.s32.f32 %v111_v58  ;;  %v177_v2 = vcvt.s32.f32 %v113_v59  ;;  %v76_v3 = vunpack.c.1.s8 %v46_v28 }
  0x11   :  { %240 = vmatpush.bf16.msra.mxu0 %v196_v60  ;;  %v197_v4 = vpack.c.bf16 %v145_v62, %v143_v61  ;;  %v138_v5 = vcvt.s32.f32 %v74_v63  ;;  %v106_v6 = vunpack.c.0.s8 %v54_v37  ;;  %v108_v7 = vunpack.c.1.s8 %v54_v37  ;;  %v50_v61 = vld [vmem:[%s533_s2 + $0x40] sm:$0xff] }
  0x12   :  { %259 = vmatpush.bf16.msra.mxu1 %v212_v0  ;;  %v213_v9 = vpack.c.bf16 %v177_v2, %v175_v1  ;;  %v140_v10 = vcvt.s32.f32 %v76_v3  ;;  %v75_v11 = vunpack.c.0.s8 %v47_v42  ;;  %v77_v12 = vunpack.c.1.s8 %v47_v42  ;;  %v43_v2 = vld [vmem:[%s533_s2 + $0x8] sm:$0xff] }
  0x13   :  { %278 = vmatpush.bf16.msra.mxu2 %v197_v4  ;;  %v170_v13 = vcvt.s32.f32 %v106_v6  ;;  %v172_v14 = vcvt.s32.f32 %v108_v7  ;;  %v107_v15 = vunpack.c.0.s8 %v55_v47  ;;  %v109_v16 = vunpack.c.1.s8 %v55_v47  ;;  %v51_v7 = vld [vmem:[%s533_s2 + $0x48] sm:$0xff] }
  0x14   :  { %297 = vmatpush.bf16.msra.mxu3 %v213_v9  ;;  %v194_v18 = vpack.c.bf16 %v140_v10, %v138_v5  ;;  %v139_v19 = vcvt.s32.f32 %v75_v11  ;;  %v141_v20 = vcvt.s32.f32 %v77_v12  ;;  %v70_v21 = vunpack.c.2.s8 %v44_v8 }
  0x15   :  { %v210_v23 = vpack.c.bf16 %v172_v14, %v170_v13  ;;  %v171_v24 = vcvt.s32.f32 %v107_v15  ;;  %v173_v25 = vcvt.s32.f32 %v109_v16  ;;  %v72_v26 = vunpack.c.3.s8 %v44_v8 }
  0x16   :  { %241 = vmatpush.bf16.msra.mxu0 %v194_v18  ;;  %v195_v28 = vpack.c.bf16 %v141_v20, %v139_v19  ;;  %v134_v29 = vcvt.s32.f32 %v70_v21  ;;  %v102_v30 = vunpack.c.2.s8 %v52_v17  ;;  %v104_v31 = vunpack.c.3.s8 %v52_v17 }
  0x17   :  { %260 = vmatpush.bf16.msra.mxu1 %v210_v23  ;;  %v211_v32 = vpack.c.bf16 %v173_v25, %v171_v24  ;;  %v136_v33 = vcvt.s32.f32 %v72_v26  ;;  %v71_v34 = vunpack.c.2.s8 %v45_v22  ;;  %v73_v35 = vunpack.c.3.s8 %v45_v22 }
  0x18   :  { %279 = vmatpush.bf16.msra.mxu2 %v195_v28  ;;  %v166_v36 = vcvt.s32.f32 %v102_v30  ;;  %v168_v37 = vcvt.s32.f32 %v104_v31  ;;  %v103_v38 = vunpack.c.2.s8 %v53_v27  ;;  %v105_v39 = vunpack.c.3.s8 %v53_v27 }
  0x19   :  { %298 = vmatpush.bf16.msra.mxu3 %v211_v32  ;;  %v192_v40 = vpack.c.bf16 %v136_v33, %v134_v29  ;;  %v135_v41 = vcvt.s32.f32 %v71_v34  ;;  %v137_v42 = vcvt.s32.f32 %v73_v35  ;;  %v66_v43 = vunpack.c.0.s8 %v44_v8 }
  0x1a   :  { %v208_v44 = vpack.c.bf16 %v168_v37, %v166_v36  ;;  %v167_v45 = vcvt.s32.f32 %v103_v38  ;;  %v169_v46 = vcvt.s32.f32 %v105_v39  ;;  %v68_v47 = vunpack.c.1.s8 %v44_v8  ;;  %v387_v36 = vld [vmem:[%s534_s1] sm:$0xf]  ;;  %v402_v37 = vld [vmem:[%s534_s1 + $0x4] sm:$0xf0] }
  0x1b   :  { %242 = vmatpush.bf16.msra.mxu0 %v192_v40  ;;  %v193_v48 = vpack.c.bf16 %v137_v42, %v135_v41  ;;  %v130_v49 = vcvt.s32.f32 %v66_v43  ;;  %v98_v50 = vunpack.c.0.s8 %v52_v17  ;;  %v100_v51 = vunpack.c.1.s8 %v52_v17  ;;  %v401_v42 = vld [vmem:[%s534_s1 + $0x4] sm:$0xf]  ;;  %v389_v43 = vld [vmem:[%s534_s1 + $0x8] sm:$0xf0] }
  0x1c   :  { %261 = vmatpush.bf16.msra.mxu1 %v208_v44  ;;  %v209_v53 = vpack.c.bf16 %v169_v46, %v167_v45  ;;  %v132_v54 = vcvt.s32.f32 %v68_v47  ;;  %v67_v55 = vunpack.c.0.s8 %v45_v22  ;;  %v69_v56 = vunpack.c.1.s8 %v45_v22 }
  0x1d   :  { %280 = vmatpush.bf16.msra.mxu2 %v193_v48  ;;  %v162_v57 = vcvt.s32.f32 %v98_v50  ;;  %v164_v58 = vcvt.s32.f32 %v100_v51  ;;  %v99_v59 = vunpack.c.0.s8 %v53_v27  ;;  %v101_v60 = vunpack.c.1.s8 %v53_v27 }
  0x1e   :  { %299 = vmatpush.bf16.msra.mxu3 %v209_v53  ;;  %v190_v62 = vpack.c.bf16 %v132_v54, %v130_v49  ;;  %v131_v63 = vcvt.s32.f32 %v67_v55  ;;  %v133_v0 = vcvt.s32.f32 %v69_v56  ;;  %v62_v1 = vunpack.c.2.s8 %v42_v52  ;;  %v395_v54 = vld [vmem:[%s534_s1 + $0x10] sm:$0xf]  ;;  %v404_v55 = vld [vmem:[%s534_s1 + $0x14] sm:$0xf0]  ;;  %v403_v56 = vld [vmem:[%s534_s1 + $0x14] sm:$0xf] }
  0x1f   :  { %v206_v3 = vpack.c.bf16 %v164_v58, %v162_v57  ;;  %v163_v4 = vcvt.s32.f32 %v99_v59  ;;  %v165_v5 = vcvt.s32.f32 %v101_v60  ;;  %v64_v6 = vunpack.c.3.s8 %v42_v52  ;;  %v397_v57 = vld [vmem:[%s534_s1 + $0x18] sm:$0xf0] }
  0x20   :  { %243 = vmatpush.bf16.msra.mxu0 %v190_v62  ;;  %v191_v8 = vpack.c.bf16 %v133_v0, %v131_v63  ;;  %v126_v9 = vcvt.s32.f32 %v62_v1  ;;  %v94_v10 = vunpack.c.2.s8 %v50_v61  ;;  %v96_v11 = vunpack.c.3.s8 %v50_v61  ;;  %v351_v62 = vld [vmem:[%s535_s3] sm:$0x3] }
  0x21   :  { %262 = vmatpush.bf16.msra.mxu1 %v206_v3  ;;  %v207_v12 = vpack.c.bf16 %v165_v5, %v163_v4  ;;  %v128_v13 = vcvt.s32.f32 %v64_v6  ;;  %v63_v14 = vunpack.c.2.s8 %v43_v2  ;;  %v65_v15 = vunpack.c.3.s8 %v43_v2 }
  0x22   :  { %281 = vmatpush.bf16.msra.mxu2 %v191_v8  ;;  %v158_v16 = vcvt.s32.f32 %v94_v10  ;;  %v160_v17 = vcvt.s32.f32 %v96_v11  ;;  %v95_v18 = vunpack.c.2.s8 %v51_v7  ;;  %v97_v19 = vunpack.c.3.s8 %v51_v7 }
  0x23   :  { %300 = vmatpush.bf16.msra.mxu3 %v207_v12  ;;  %v188_v20 = vpack.c.bf16 %v128_v13, %v126_v9  ;;  %v127_v21 = vcvt.s32.f32 %v63_v14  ;;  %v129_v22 = vcvt.s32.f32 %v65_v15  ;;  %v58_v23 = vunpack.c.0.s8 %v42_v52 }
  0x24   :  { %v204_v24 = vpack.c.bf16 %v160_v17, %v158_v16  ;;  %v159_v25 = vcvt.s32.f32 %v95_v18  ;;  %v161_v26 = vcvt.s32.f32 %v97_v19  ;;  %v60_v27 = vunpack.c.1.s8 %v42_v52 }
  0x25   :  { %244 = vmatpush.bf16.msra.mxu0 %v188_v20  ;;  %v189_v28 = vpack.c.bf16 %v129_v22, %v127_v21  ;;  %v122_v29 = vcvt.s32.f32 %v58_v23  ;;  %v90_v30 = vunpack.c.0.s8 %v50_v61  ;;  %v92_v31 = vunpack.c.1.s8 %v50_v61 }
  0x26   :  { %263 = vmatpush.bf16.msra.mxu1 %v204_v24  ;;  %v205_v32 = vpack.c.bf16 %v161_v26, %v159_v25  ;;  %v124_v33 = vcvt.s32.f32 %v60_v27  ;;  %v59_v34 = vunpack.c.0.s8 %v43_v2  ;;  %v61_v35 = vunpack.c.1.s8 %v43_v2 }
  0x27   :  { %282 = vmatpush.bf16.msra.mxu2 %v189_v28  ;;  %v154_v38 = vcvt.s32.f32 %v90_v30  ;;  %v156_v39 = vcvt.s32.f32 %v92_v31  ;;  %v91_v40 = vunpack.c.0.s8 %v51_v7  ;;  %v93_v41 = vunpack.c.1.s8 %v51_v7 }
  0x28   :  { %301 = vmatpush.bf16.msra.mxu3 %v205_v32  ;;  %v186_v44 = vpack.c.bf16 %v124_v33, %v122_v29  ;;  %v123_v45 = vcvt.s32.f32 %v59_v34  ;;  %v125_v46 = vcvt.s32.f32 %v61_v35  ;;  %v388_v50 = vor.u32 %v402_v37, %v387_v36 }
  0x29   :  { %v202_v47 = vpack.c.bf16 %v156_v39, %v154_v38  ;;  %v155_v48 = vcvt.s32.f32 %v91_v40  ;;  %v157_v49 = vcvt.s32.f32 %v93_v41  ;;  %v392_v52 = vor.u32 %v401_v42, %v389_v43 }
  0x2a   :  { %245 = vmatpush.bf16.msra.mxu0 %v186_v44  ;;  %v187_v51 = vpack.c.bf16 %v125_v46, %v123_v45  ;;  %v396_v58 = vor.u32 %v404_v55, %v395_v54  ;;  %v400_v59 = vor.u32 %v403_v56, %v397_v57  ;;  %v342_v0 = vstv %s536_s0 }
  0x2b   :  { %264 = vmatpush.bf16.msra.mxu1 %v202_v47  ;;  %v203_v53 = vpack.c.bf16 %v157_v49, %v155_v48  ;;  %v353_v1 = vperm.slane %v351_v62, 0  ;;  %v354_v11 = vperm.slane %v351_v62, 1 }
  0x2c   :  { %283 = vmatpush.bf16.msra.mxu2 %v187_v51 }
  0x2d   :  { %302 = vmatpush.bf16.msra.mxu3 %v203_v53  ;;  %246 = vmatmul.bf16.vlgmr.msra.gmra.mxu0 %v388_v50 }
  0x2e   :  { %265 = vmatmul.bf16.vlgmr.msra.gmra.mxu1 %v392_v52 }
  0x2f   :  { %284 = vmatmul.bf16.vlgmr.msra.gmra.mxu2 %v388_v50 }
  0x30   :  { %303 = vmatmul.bf16.vlgmr.msra.gmra.mxu3 %v392_v52 }
  0x3d   :  { %251 = vmatmul.bf16.gmra.mxu0 %v396_v58 }
  0x3e   :  { %270 = vmatmul.bf16.gmra.mxu1 %v400_v59 }
  0x3f   :  { %289 = vmatmul.bf16.gmra.mxu2 %v396_v58 }
  0x40   :  { %308 = vmatmul.bf16.gmra.mxu3 %v400_v59 }
  0xaa   :  { %v247_v60 = vpop.f32.mrf.mxu0 }
  0xab   :  { %v266_v61 = vpop.f32.mrf.mxu1 }
  0xac   :  { %v267_v63 = vadd.f32 %v266_v61, %v247_v60 }
  0xae   :  { %v343_v2 = vmul.f32 %v342_v0, %v267_v63 }
  0xb0   :  { %v357_v3 = vadd.f32 %v353_v1, %v343_v2 }
  0xb2   :  { %v285_v4 = vpop.f32.mrf.mxu2  ;;  %v249_v5 = vpop.f32.mrf.mxu0  ;;  %v365_v8 = vmax.f32 %v357_v3, 0.0 }
  0xb3   :  { %v304_v6 = vpop.f32.mrf.mxu3  ;;  %v268_v7 = vpop.f32.mrf.mxu1 }
  0xb4   :  { %v305_v9 = vadd.f32 %v304_v6, %v285_v4  ;;  %v269_v10 = vadd.f32 %v268_v7, %v249_v5  ;;  %373 = vst [vmem:[%s537_s4] sm:$0xff] %v365_v8 }
  0xb6   :  { %v344_v12 = vmul.f32 %v342_v0, %v305_v9  ;;  %v345_v13 = vmul.f32 %v342_v0, %v269_v10 }
  0xb8   :  { %v358_v14 = vadd.f32 %v354_v11, %v344_v12  ;;  %v359_v15 = vadd.f32 %v353_v1, %v345_v13 }
  0xba   :  { %v287_v16 = vpop.f32.mrf.mxu2  ;;  %v252_v17 = vpop.f32.mrf.mxu0  ;;  %v366_v20 = vmax.f32 %v358_v14, 0.0  ;;  %v367_v21 = vmax.f32 %v359_v15, 0.0 }
  0xbb   :  { %v306_v18 = vpop.f32.mrf.mxu3  ;;  %v271_v19 = vpop.f32.mrf.mxu1 }
  0xbc   :  { %v307_v22 = vadd.f32 %v306_v18, %v287_v16  ;;  %v272_v23 = vadd.f32 %v271_v19, %v252_v17  ;;  %374 = vst [vmem:[%s537_s4 + $0x8] sm:$0xff] %v366_v20 }
  0xbd   :  { %375 = vst [vmem:[%s537_s4 + $0x10] sm:$0xff] %v367_v21 }
  0xbe   :  { %v346_v24 = vmul.f32 %v342_v0, %v307_v22  ;;  %v347_v25 = vmul.f32 %v342_v0, %v272_v23 }
  0xc0   :  { %v360_v26 = vadd.f32 %v354_v11, %v346_v24  ;;  %v361_v27 = vadd.f32 %v353_v1, %v347_v25 }
  0xc2   :  { %v290_v28 = vpop.f32.mrf.mxu2  ;;  %v254_v29 = vpop.f32.mrf.mxu0  ;;  %v368_v32 = vmax.f32 %v360_v26, 0.0  ;;  %v369_v33 = vmax.f32 %v361_v27, 0.0 }
  0xc3   :  { %v309_v30 = vpop.f32.mrf.mxu3  ;;  %v273_v31 = vpop.f32.mrf.mxu1 }
  0xc4   :  { %v310_v34 = vadd.f32 %v309_v30, %v290_v28  ;;  %v274_v35 = vadd.f32 %v273_v31, %v254_v29  ;;  %376 = vst [vmem:[%s537_s4 + $0x18] sm:$0xff] %v368_v32 }
  0xc5   :  { %377 = vst [vmem:[%s537_s4 + $0x20] sm:$0xff] %v369_v33 }
  0xc6   :  { %v348_v36 = vmul.f32 %v342_v0, %v310_v34  ;;  %v349_v37 = vmul.f32 %v342_v0, %v274_v35 }
  0xc8   :  { %v362_v38 = vadd.f32 %v354_v11, %v348_v36  ;;  %v363_v39 = vadd.f32 %v353_v1, %v349_v37 }
  0xca   :  { %v292_v40 = vpop.f32.mrf.mxu2  ;;  %v370_v42 = vmax.f32 %v362_v38, 0.0  ;;  %v371_v43 = vmax.f32 %v363_v39, 0.0 }
  0xcb   :  { %v311_v41 = vpop.f32.mrf.mxu3 }
  0xcc   :  { %v312_v44 = vadd.f32 %v311_v41, %v292_v40  ;;  %378 = vst [vmem:[%s537_s4 + $0x28] sm:$0xff] %v370_v42 }
  0xcd   :  { %379 = vst [vmem:[%s537_s4 + $0x30] sm:$0xff] %v371_v43 }
  0xce   :  { %v350_v45 = vmul.f32 %v342_v0, %v312_v44 }
  0xd0   :  { %v364_v46 = vadd.f32 %v354_v11, %v350_v45 }
  0xd2   :  { %v372_v47 = vmax.f32 %v364_v46, 0.0 }
  0xd4   :  { %380 = vst [vmem:[%s537_s4 + $0x38] sm:$0xff] %v372_v47 }

// kernel: quantizemodel_forward.3
= control target key start
LH: loop header
LB: loop body
LE: loop exit
PB: predicated region body
PF: predicated region fallthrough
CT: control target
= control target key end

     0   :  { %s2657_s0 = inlined_call_operand.<no memory space> [shape: f32[1], index: 0, kind: input, shape index: {}]   ;;  %s2658_s1 = inlined_call_operand.vmem [shape: bf16[32,256], index: 1, kind: input, shape index: {}]   ;;  %s2659_s2 = inlined_call_operand.vmem [shape: s8[256,1024], index: 2, kind: input, shape index: {}]   ;;  %s2660_s3 = inlined_call_operand.vmem [shape: s32[32,1], index: 3, kind: input, shape index: {}]   ;;  %s2661_s4 = inlined_call_operand.hbm [shape: f32[32,1024], index: 4, kind: output, shape index: {0}]   ;;  %s2662_s5 = inlined_call_operand.vmem [shape: f32[32,1], index: 5, kind: output, shape index: {1}]  }
   0x1   :  { %v135_v0 = vld [vmem:[%s2659_s2 + $0xc0] sm:$0xff]  ;;  %v136_v2 = vld [vmem:[%s2659_s2 + $0xc8] sm:$0xff] }
   0x2   :  { %v167_v1 = vld [vmem:[%s2659_s2 + $0x1c0] sm:$0xff]  ;;  %v287_v3 = vunpack.c.2.s8 %v135_v0  ;;  %v295_v4 = vunpack.c.3.s8 %v135_v0  ;;  %v168_v7 = vld [vmem:[%s2659_s2 + $0x1c8] sm:$0xff]  ;;  %v288_v8 = vunpack.c.2.s8 %v136_v2  ;;  %v296_v9 = vunpack.c.3.s8 %v136_v2 }
   0x3   :  { %v415_v5 = vunpack.c.2.s8 %v167_v1  ;;  %v423_v6 = vunpack.c.3.s8 %v167_v1  ;;  %v416_v10 = vunpack.c.2.s8 %v168_v7  ;;  %v424_v11 = vunpack.c.3.s8 %v168_v7 }
   0x4   :  { %v543_v12 = vcvt.s32.f32 %v287_v3  ;;  %v551_v13 = vcvt.s32.f32 %v295_v4  ;;  %v544_v16 = vcvt.s32.f32 %v288_v8  ;;  %v552_v17 = vcvt.s32.f32 %v296_v9 }
   0x5   :  { %v671_v14 = vcvt.s32.f32 %v415_v5  ;;  %v679_v15 = vcvt.s32.f32 %v423_v6  ;;  %v672_v18 = vcvt.s32.f32 %v416_v10  ;;  %v680_v19 = vcvt.s32.f32 %v424_v11 }
   0x6   :  { %v743_v20 = vpack.c.bf16 %v551_v13, %v543_v12  ;;  %v271_v22 = vunpack.c.0.s8 %v135_v0  ;;  %v279_v23 = vunpack.c.1.s8 %v135_v0 }
   0x7   :  { %v807_v21 = vpack.c.bf16 %v679_v15, %v671_v14 }
   0x8   :  { %12 = vsyncpa [#allocation7], 0  ;;  %v744_v24 = vpack.c.bf16 %v552_v17, %v544_v16  ;;  %v808_v25 = vpack.c.bf16 %v680_v19, %v672_v18  ;;  %v399_v26 = vunpack.c.0.s8 %v167_v1  ;;  %v407_v27 = vunpack.c.1.s8 %v167_v1  ;;  %v127_v28 = vld [vmem:[%s2659_s2 + $0x80] sm:$0xff]  ;;  %835 = vmatpush.bf16.msra.mxu0 %v743_v20  ;;  %v128_v42 = vld [vmem:[%s2659_s2 + $0x88] sm:$0xff]  ;;  %s1741_s17 = sshll.u32 %s2661_s4, 4  ;;  %s1899_s18 = smov [#allocation6]   ;;  %s1742_s17 = int_to_ptr.hbm [resolvable:$true] %s1741_s17 }
   0x9   :  { %854 = vmatpush.bf16.msra.mxu1 %v807_v21  ;;  %v527_v29 = vcvt.s32.f32 %v271_v22  ;;  %v535_v30 = vcvt.s32.f32 %v279_v23  ;;  %v272_v31 = vunpack.c.0.s8 %v136_v2  ;;  %v280_v32 = vunpack.c.1.s8 %v136_v2  ;;  %v159_v37 = vld [vmem:[%s2659_s2 + $0x180] sm:$0xff]  ;;  %v160_v47 = vld [vmem:[%s2659_s2 + $0x188] sm:$0xff]  ;;  %s1739_s19 = sshll.u32 %s1899_s18, 4  ;;  %s1900_s20 = smov 1024   ;;  %s1740_s19 = int_to_ptr.vmem [resolvable:$true] %s1739_s19 }
   0xa   :  { %873 = vmatpush.bf16.msra.mxu2 %v744_v24  ;;  %892 = vmatpush.bf16.msra.mxu3 %v808_v25  ;;  %v655_v33 = vcvt.s32.f32 %v399_v26  ;;  %v663_v34 = vcvt.s32.f32 %v407_v27  ;;  %v400_v35 = vunpack.c.0.s8 %v168_v7  ;;  %v408_v36 = vunpack.c.1.s8 %v168_v7  ;;  %v119_v8 = vld [vmem:[%s2659_s2 + $0x40] sm:$0xff]  ;;  %v120_v22 = vld [vmem:[%s2659_s2 + $0x48] sm:$0xff]  ;;  %s1901_s21 = smov 64  }
   0xb   :  { %v735_v38 = vpack.c.bf16 %v535_v30, %v527_v29  ;;  %v528_v39 = vcvt.s32.f32 %v272_v31  ;;  %v536_v40 = vcvt.s32.f32 %v280_v32  ;;  %v255_v41 = vunpack.c.2.s8 %v127_v28  ;;  %v151_v17 = vld [vmem:[%s2659_s2 + $0x140] sm:$0xff]  ;;  %v152_v27 = vld [vmem:[%s2659_s2 + $0x148] sm:$0xff] }
   0xc   :  { %v799_v43 = vpack.c.bf16 %v663_v34, %v655_v33  ;;  %v656_v44 = vcvt.s32.f32 %v400_v35  ;;  %v664_v45 = vcvt.s32.f32 %v408_v36  ;;  %v263_v46 = vunpack.c.3.s8 %v127_v28 }
   0xd   :  { %836 = vmatpush.bf16.msra.mxu0 %v735_v38  ;;  %v736_v48 = vpack.c.bf16 %v536_v40, %v528_v39  ;;  %v511_v49 = vcvt.s32.f32 %v255_v41  ;;  %v383_v50 = vunpack.c.2.s8 %v159_v37  ;;  %v391_v51 = vunpack.c.3.s8 %v159_v37 }
   0xe   :  { %855 = vmatpush.bf16.msra.mxu1 %v799_v43  ;;  %v800_v52 = vpack.c.bf16 %v664_v45, %v656_v44  ;;  %v519_v53 = vcvt.s32.f32 %v263_v46  ;;  %v256_v54 = vunpack.c.2.s8 %v128_v42  ;;  %v264_v55 = vunpack.c.3.s8 %v128_v42 }
   0xf   :  { %874 = vmatpush.bf16.msra.mxu2 %v736_v48  ;;  %v639_v56 = vcvt.s32.f32 %v383_v50  ;;  %v647_v57 = vcvt.s32.f32 %v391_v51  ;;  %v384_v58 = vunpack.c.2.s8 %v160_v47  ;;  %v392_v59 = vunpack.c.3.s8 %v160_v47 }
  0x10   :  { %893 = vmatpush.bf16.msra.mxu3 %v800_v52  ;;  %v727_v60 = vpack.c.bf16 %v519_v53, %v511_v49  ;;  %v512_v61 = vcvt.s32.f32 %v256_v54  ;;  %v520_v62 = vcvt.s32.f32 %v264_v55  ;;  %v239_v63 = vunpack.c.0.s8 %v127_v28  ;;  %v111_v52 = vld [vmem:[%s2659_s2] sm:$0xff] }
  0x11   :  { %v791_v0 = vpack.c.bf16 %v647_v57, %v639_v56  ;;  %v640_v1 = vcvt.s32.f32 %v384_v58  ;;  %v648_v2 = vcvt.s32.f32 %v392_v59  ;;  %v247_v3 = vunpack.c.1.s8 %v127_v28 }
  0x12   :  { %837 = vmatpush.bf16.msra.mxu0 %v727_v60  ;;  %v728_v4 = vpack.c.bf16 %v520_v62, %v512_v61  ;;  %v495_v5 = vcvt.s32.f32 %v239_v63  ;;  %v367_v6 = vunpack.c.0.s8 %v159_v37  ;;  %v375_v7 = vunpack.c.1.s8 %v159_v37  ;;  %v143_v61 = vld [vmem:[%s2659_s2 + $0x100] sm:$0xff] }
  0x13   :  { %856 = vmatpush.bf16.msra.mxu1 %v791_v0  ;;  %v792_v9 = vpack.c.bf16 %v648_v2, %v640_v1  ;;  %v503_v10 = vcvt.s32.f32 %v247_v3  ;;  %v240_v11 = vunpack.c.0.s8 %v128_v42  ;;  %v248_v12 = vunpack.c.1.s8 %v128_v42  ;;  %v112_v2 = vld [vmem:[%s2659_s2 + $0x8] sm:$0xff] }
  0x14   :  { %875 = vmatpush.bf16.msra.mxu2 %v728_v4  ;;  %v623_v13 = vcvt.s32.f32 %v367_v6  ;;  %v631_v14 = vcvt.s32.f32 %v375_v7  ;;  %v368_v15 = vunpack.c.0.s8 %v160_v47  ;;  %v376_v16 = vunpack.c.1.s8 %v160_v47  ;;  %v144_v7 = vld [vmem:[%s2659_s2 + $0x108] sm:$0xff] }
  0x15   :  { %894 = vmatpush.bf16.msra.mxu3 %v792_v9  ;;  %v719_v18 = vpack.c.bf16 %v503_v10, %v495_v5  ;;  %v496_v19 = vcvt.s32.f32 %v240_v11  ;;  %v504_v20 = vcvt.s32.f32 %v248_v12  ;;  %v223_v21 = vunpack.c.2.s8 %v119_v8 }
  0x16   :  { %v783_v23 = vpack.c.bf16 %v631_v14, %v623_v13  ;;  %v624_v24 = vcvt.s32.f32 %v368_v15  ;;  %v632_v25 = vcvt.s32.f32 %v376_v16  ;;  %v231_v26 = vunpack.c.3.s8 %v119_v8 }
  0x17   :  { %838 = vmatpush.bf16.msra.mxu0 %v719_v18  ;;  %v720_v28 = vpack.c.bf16 %v504_v20, %v496_v19  ;;  %v479_v29 = vcvt.s32.f32 %v223_v21  ;;  %v351_v30 = vunpack.c.2.s8 %v151_v17  ;;  %v359_v31 = vunpack.c.3.s8 %v151_v17 }
  0x18   :  { %857 = vmatpush.bf16.msra.mxu1 %v783_v23  ;;  %v784_v32 = vpack.c.bf16 %v632_v25, %v624_v24  ;;  %v487_v33 = vcvt.s32.f32 %v231_v26  ;;  %v224_v34 = vunpack.c.2.s8 %v120_v22  ;;  %v232_v35 = vunpack.c.3.s8 %v120_v22 }
  0x19   :  { %876 = vmatpush.bf16.msra.mxu2 %v720_v28  ;;  %v607_v36 = vcvt.s32.f32 %v351_v30  ;;  %v615_v37 = vcvt.s32.f32 %v359_v31  ;;  %v352_v38 = vunpack.c.2.s8 %v152_v27  ;;  %v360_v39 = vunpack.c.3.s8 %v152_v27 }
  0x1a   :  { %895 = vmatpush.bf16.msra.mxu3 %v784_v32  ;;  %v711_v40 = vpack.c.bf16 %v487_v33, %v479_v29  ;;  %v480_v41 = vcvt.s32.f32 %v224_v34  ;;  %v488_v42 = vcvt.s32.f32 %v232_v35  ;;  %v207_v43 = vunpack.c.0.s8 %v119_v8  ;;  %v1759_v32 = vld [vmem:[%s2658_s1] sm:$0xf]  ;;  %v1778_v33 = vld [vmem:[%s2658_s1 + $0x4] sm:$0xf0] }
  0x1b   :  { %v775_v44 = vpack.c.bf16 %v615_v37, %v607_v36  ;;  %v608_v45 = vcvt.s32.f32 %v352_v38  ;;  %v616_v46 = vcvt.s32.f32 %v360_v39  ;;  %v215_v47 = vunpack.c.1.s8 %v119_v8  ;;  %v1777_v38 = vld [vmem:[%s2658_s1 + $0x4] sm:$0xf]  ;;  %v1761_v39 = vld [vmem:[%s2658_s1 + $0x8] sm:$0xf0] }
  0x1c   :  { %839 = vmatpush.bf16.msra.mxu0 %v711_v40  ;;  %v712_v48 = vpack.c.bf16 %v488_v42, %v480_v41  ;;  %v463_v49 = vcvt.s32.f32 %v207_v43  ;;  %v335_v50 = vunpack.c.0.s8 %v151_v17  ;;  %v343_v51 = vunpack.c.1.s8 %v151_v17 }
  0x1d   :  { %858 = vmatpush.bf16.msra.mxu1 %v775_v44  ;;  %v776_v53 = vpack.c.bf16 %v616_v46, %v608_v45  ;;  %v471_v54 = vcvt.s32.f32 %v215_v47  ;;  %v208_v55 = vunpack.c.0.s8 %v120_v22  ;;  %v216_v56 = vunpack.c.1.s8 %v120_v22  ;;  %v138_v44 = vld [vmem:[%s2659_s2 + $0xd8] sm:$0xff] }
  0x1e   :  { %877 = vmatpush.bf16.msra.mxu2 %v712_v48  ;;  %v591_v57 = vcvt.s32.f32 %v335_v50  ;;  %v599_v58 = vcvt.s32.f32 %v343_v51  ;;  %v336_v59 = vunpack.c.0.s8 %v152_v27  ;;  %v344_v60 = vunpack.c.1.s8 %v152_v27  ;;  %v170_v45 = vld [vmem:[%s2659_s2 + $0x1d8] sm:$0xff]  ;;  %v137_v50 = vld [vmem:[%s2659_s2 + $0xd0] sm:$0xff] }
  0x1f   :  { %896 = vmatpush.bf16.msra.mxu3 %v776_v53  ;;  %v703_v62 = vpack.c.bf16 %v471_v54, %v463_v49  ;;  %v464_v63 = vcvt.s32.f32 %v208_v55  ;;  %v472_v0 = vcvt.s32.f32 %v216_v56  ;;  %v191_v1 = vunpack.c.2.s8 %v111_v52  ;;  %v169_v55 = vld [vmem:[%s2659_s2 + $0x1d0] sm:$0xff] }
  0x20   :  { %v767_v3 = vpack.c.bf16 %v599_v58, %v591_v57  ;;  %v592_v4 = vcvt.s32.f32 %v336_v59  ;;  %v600_v5 = vcvt.s32.f32 %v344_v60  ;;  %v199_v6 = vunpack.c.3.s8 %v111_v52 }
  0x21   :  { %840 = vmatpush.bf16.msra.mxu0 %v703_v62  ;;  %v704_v8 = vpack.c.bf16 %v472_v0, %v464_v63  ;;  %v447_v9 = vcvt.s32.f32 %v191_v1  ;;  %v319_v10 = vunpack.c.2.s8 %v143_v61  ;;  %v327_v11 = vunpack.c.3.s8 %v143_v61 }
  0x22   :  { %859 = vmatpush.bf16.msra.mxu1 %v767_v3  ;;  %v768_v12 = vpack.c.bf16 %v600_v5, %v592_v4  ;;  %v455_v13 = vcvt.s32.f32 %v199_v6  ;;  %v192_v14 = vunpack.c.2.s8 %v112_v2  ;;  %v200_v15 = vunpack.c.3.s8 %v112_v2 }
  0x23   :  { %878 = vmatpush.bf16.msra.mxu2 %v704_v8  ;;  %v575_v16 = vcvt.s32.f32 %v319_v10  ;;  %v583_v17 = vcvt.s32.f32 %v327_v11  ;;  %v320_v18 = vunpack.c.2.s8 %v144_v7  ;;  %v328_v19 = vunpack.c.3.s8 %v144_v7 }
  0x24   :  { %897 = vmatpush.bf16.msra.mxu3 %v768_v12  ;;  %v695_v20 = vpack.c.bf16 %v455_v13, %v447_v9  ;;  %v448_v21 = vcvt.s32.f32 %v192_v14  ;;  %v456_v22 = vcvt.s32.f32 %v200_v15  ;;  %v175_v23 = vunpack.c.0.s8 %v111_v52 }
  0x25   :  { %v759_v24 = vpack.c.bf16 %v583_v17, %v575_v16  ;;  %v576_v25 = vcvt.s32.f32 %v320_v18  ;;  %v584_v26 = vcvt.s32.f32 %v328_v19  ;;  %v183_v27 = vunpack.c.1.s8 %v111_v52 }
  0x26   :  { %841 = vmatpush.bf16.msra.mxu0 %v695_v20  ;;  %v696_v28 = vpack.c.bf16 %v456_v22, %v448_v21  ;;  %v431_v29 = vcvt.s32.f32 %v175_v23  ;;  %v303_v30 = vunpack.c.0.s8 %v143_v61  ;;  %v311_v31 = vunpack.c.1.s8 %v143_v61  ;;  %v130_v20 = vld [vmem:[%s2659_s2 + $0x98] sm:$0xff] }
  0x27   :  { %860 = vmatpush.bf16.msra.mxu1 %v759_v24  ;;  %v760_v34 = vpack.c.bf16 %v584_v26, %v576_v25  ;;  %v439_v35 = vcvt.s32.f32 %v183_v27  ;;  %v176_v36 = vunpack.c.0.s8 %v112_v2  ;;  %v184_v37 = vunpack.c.1.s8 %v112_v2  ;;  %v162_v25 = vld [vmem:[%s2659_s2 + $0x198] sm:$0xff] }
  0x28   :  { %879 = vmatpush.bf16.msra.mxu2 %v696_v28  ;;  %v559_v40 = vcvt.s32.f32 %v303_v30  ;;  %v567_v41 = vcvt.s32.f32 %v311_v31  ;;  %v304_v42 = vunpack.c.0.s8 %v144_v7  ;;  %v312_v43 = vunpack.c.1.s8 %v144_v7  ;;  %v129_v30 = vld [vmem:[%s2659_s2 + $0x90] sm:$0xff] }
  0x29   :  { %898 = vmatpush.bf16.msra.mxu3 %v760_v34  ;;  %v687_v46 = vpack.c.bf16 %v439_v35, %v431_v29  ;;  %v432_v47 = vcvt.s32.f32 %v176_v36  ;;  %v440_v48 = vcvt.s32.f32 %v184_v37  ;;  %v1998_v49 = vor.u32 %v1778_v33, %v1759_v32 }
  0x2a   :  { %v751_v51 = vpack.c.bf16 %v567_v41, %v559_v40  ;;  %v560_v52 = vcvt.s32.f32 %v304_v42  ;;  %v568_v53 = vcvt.s32.f32 %v312_v43  ;;  %v2003_v54 = vor.u32 %v1777_v38, %v1761_v39  ;;  %v161_v39 = vld [vmem:[%s2659_s2 + $0x190] sm:$0xff] }
  0x2b   :  { %842 = vmatpush.bf16.msra.mxu0 %v687_v46  ;;  %v688_v56 = vpack.c.bf16 %v440_v48, %v432_v47  ;;  %v290_v57 = vunpack.c.2.s8 %v138_v44  ;;  %v298_v58 = vunpack.c.3.s8 %v138_v44  ;;  %v418_v59 = vunpack.c.2.s8 %v170_v45 }
  0x2c   :  { %861 = vmatpush.bf16.msra.mxu1 %v751_v51  ;;  %v752_v60 = vpack.c.bf16 %v568_v53, %v560_v52  ;;  %v426_v61 = vunpack.c.3.s8 %v170_v45  ;;  %v289_v62 = vunpack.c.2.s8 %v137_v50  ;;  %v297_v63 = vunpack.c.3.s8 %v137_v50 }
  0x2d   :  { %880 = vmatpush.bf16.msra.mxu2 %v688_v56  ;;  %v546_v0 = vcvt.s32.f32 %v290_v57  ;;  %v554_v1 = vcvt.s32.f32 %v298_v58  ;;  %v674_v2 = vcvt.s32.f32 %v418_v59  ;;  %v417_v3 = vunpack.c.2.s8 %v169_v55 }
  0x2e   :  { %899 = vmatpush.bf16.msra.mxu3 %v752_v60  ;;  %843 = vmatmul.bf16.vlgmr.msra.gmra.mxu0 %v1998_v49  ;;  %v682_v4 = vcvt.s32.f32 %v426_v61  ;;  %v545_v5 = vcvt.s32.f32 %v289_v62  ;;  %v553_v6 = vcvt.s32.f32 %v297_v63  ;;  %v425_v7 = vunpack.c.3.s8 %v169_v55  ;;  %v1767_v62 = vld [vmem:[%s2658_s1 + $0x10] sm:$0xf] }
  0x2f   :  { %862 = vmatmul.bf16.vlgmr.msra.gmra.mxu1 %v2003_v54  ;;  %v746_v8 = vpack.c.bf16 %v554_v1, %v546_v0  ;;  %v673_v9 = vcvt.s32.f32 %v417_v3  ;;  %v274_v10 = vunpack.c.0.s8 %v138_v44  ;;  %v282_v11 = vunpack.c.1.s8 %v138_v44  ;;  %v1780_v3 = vld [vmem:[%s2658_s1 + $0x14] sm:$0xf0] }
  0x30   :  { %881 = vmatmul.bf16.vlgmr.msra.gmra.mxu2 %v1998_v49  ;;  %v810_v12 = vpack.c.bf16 %v682_v4, %v674_v2  ;;  %v745_v13 = vpack.c.bf16 %v553_v6, %v545_v5  ;;  %v681_v14 = vcvt.s32.f32 %v425_v7  ;;  %v402_v15 = vunpack.c.0.s8 %v170_v45  ;;  %v1779_v4 = vld [vmem:[%s2658_s1 + $0x14] sm:$0xf]  ;;  %v1769_v5 = vld [vmem:[%s2658_s1 + $0x18] sm:$0xf0] }
  0x31   :  { %900 = vmatmul.bf16.vlgmr.msra.gmra.mxu3 %v2003_v54  ;;  %949 = vmatpush.bf16.msrb.mxu2 %v746_v8  ;;  %v530_v16 = vcvt.s32.f32 %v274_v10  ;;  %v538_v17 = vcvt.s32.f32 %v282_v11  ;;  %v410_v18 = vunpack.c.1.s8 %v170_v45  ;;  %v273_v19 = vunpack.c.0.s8 %v137_v50  ;;  %v122_v10 = vld [vmem:[%s2659_s2 + $0x58] sm:$0xff] }
  0x32   :  { %968 = vmatpush.bf16.msrb.mxu3 %v810_v12  ;;  %911 = vmatpush.bf16.msrb.mxu0 %v745_v13  ;;  %v809_v21 = vpack.c.bf16 %v681_v14, %v673_v9  ;;  %v658_v22 = vcvt.s32.f32 %v402_v15  ;;  %v281_v23 = vunpack.c.1.s8 %v137_v50  ;;  %v401_v24 = vunpack.c.0.s8 %v169_v55  ;;  %v154_v15 = vld [vmem:[%s2659_s2 + $0x158] sm:$0xff] }
  0x33   :  { %v738_v26 = vpack.c.bf16 %v538_v17, %v530_v16  ;;  %v666_v27 = vcvt.s32.f32 %v410_v18  ;;  %v529_v28 = vcvt.s32.f32 %v273_v19  ;;  %v409_v29 = vunpack.c.1.s8 %v169_v55  ;;  %v121_v16 = vld [vmem:[%s2659_s2 + $0x50] sm:$0xff] }
  0x34   :  { %930 = vmatpush.bf16.msrb.mxu1 %v809_v21  ;;  %v537_v31 = vcvt.s32.f32 %v281_v23  ;;  %v657_v32 = vcvt.s32.f32 %v401_v24  ;;  %v258_v33 = vunpack.c.2.s8 %v130_v20  ;;  %v266_v34 = vunpack.c.3.s8 %v130_v20 }
  0x35   :  { %950 = vmatpush.bf16.msrb.mxu2 %v738_v26  ;;  %v802_v35 = vpack.c.bf16 %v666_v27, %v658_v22  ;;  %v665_v36 = vcvt.s32.f32 %v409_v29  ;;  %v386_v37 = vunpack.c.2.s8 %v162_v25  ;;  %v394_v38 = vunpack.c.3.s8 %v162_v25 }
  0x36   :  { %v737_v40 = vpack.c.bf16 %v537_v31, %v529_v28  ;;  %v514_v41 = vcvt.s32.f32 %v258_v33  ;;  %v522_v42 = vcvt.s32.f32 %v266_v34  ;;  %v257_v43 = vunpack.c.2.s8 %v129_v30 }
  0x37   :  { %969 = vmatpush.bf16.msrb.mxu3 %v802_v35  ;;  %v801_v44 = vpack.c.bf16 %v665_v36, %v657_v32  ;;  %v642_v45 = vcvt.s32.f32 %v386_v37  ;;  %v650_v46 = vcvt.s32.f32 %v394_v38  ;;  %v265_v47 = vunpack.c.3.s8 %v129_v30 }
  0x38   :  { %912 = vmatpush.bf16.msrb.mxu0 %v737_v40  ;;  %v730_v48 = vpack.c.bf16 %v522_v42, %v514_v41  ;;  %v513_v50 = vcvt.s32.f32 %v257_v43  ;;  %v385_v51 = vunpack.c.2.s8 %v161_v39  ;;  %v393_v52 = vunpack.c.3.s8 %v161_v39 }
  0x39   :  { %931 = vmatpush.bf16.msrb.mxu1 %v801_v44  ;;  %v794_v53 = vpack.c.bf16 %v650_v46, %v642_v45  ;;  %v521_v55 = vcvt.s32.f32 %v265_v47  ;;  %v242_v56 = vunpack.c.0.s8 %v130_v20  ;;  %v250_v57 = vunpack.c.1.s8 %v130_v20 }
  0x3a   :  { %951 = vmatpush.bf16.msrb.mxu2 %v730_v48  ;;  %v641_v58 = vcvt.s32.f32 %v385_v51  ;;  %v649_v59 = vcvt.s32.f32 %v393_v52  ;;  %v370_v60 = vunpack.c.0.s8 %v162_v25  ;;  %v378_v61 = vunpack.c.1.s8 %v162_v25  ;;  %v153_v25 = vld [vmem:[%s2659_s2 + $0x150] sm:$0xff]  ;;  %v114_v51 = vld [vmem:[%s2659_s2 + $0x18] sm:$0xff] }
  0x3b   :  { %970 = vmatpush.bf16.msrb.mxu3 %v794_v53  ;;  %v729_v63 = vpack.c.bf16 %v521_v55, %v513_v50  ;;  %v498_v0 = vcvt.s32.f32 %v242_v56  ;;  %v506_v1 = vcvt.s32.f32 %v250_v57  ;;  %v241_v2 = vunpack.c.0.s8 %v129_v30 }
  0x3c   :  { %v793_v6 = vpack.c.bf16 %v649_v59, %v641_v58  ;;  %v626_v7 = vcvt.s32.f32 %v370_v60  ;;  %v634_v8 = vcvt.s32.f32 %v378_v61  ;;  %v249_v9 = vunpack.c.1.s8 %v129_v30  ;;  %v146_v61 = vld [vmem:[%s2659_s2 + $0x118] sm:$0xff] }
  0x3d   :  { %913 = vmatpush.bf16.msrb.mxu0 %v729_v63  ;;  %v722_v11 = vpack.c.bf16 %v506_v1, %v498_v0  ;;  %v497_v12 = vcvt.s32.f32 %v241_v2  ;;  %v369_v13 = vunpack.c.0.s8 %v161_v39  ;;  %v377_v14 = vunpack.c.1.s8 %v161_v39  ;;  %v113_v2 = vld [vmem:[%s2659_s2 + $0x10] sm:$0xff] }
  0x3e   :  { %932 = vmatpush.bf16.msrb.mxu1 %v793_v6  ;;  %v786_v17 = vpack.c.bf16 %v634_v8, %v626_v7  ;;  %v505_v18 = vcvt.s32.f32 %v249_v9  ;;  %v2045_v19 = vor.u32 %v1780_v3, %v1767_v62  ;;  %v2047_v20 = vor.u32 %v1779_v4, %v1769_v5  ;;  %v145_v7 = vld [vmem:[%s2659_s2 + $0x110] sm:$0xff] }
  0x3f   :  { %952 = vmatpush.bf16.msrb.mxu2 %v722_v11  ;;  %v625_v21 = vcvt.s32.f32 %v369_v13  ;;  %v633_v22 = vcvt.s32.f32 %v377_v14  ;;  %v226_v23 = vunpack.c.2.s8 %v122_v10  ;;  %v234_v24 = vunpack.c.3.s8 %v122_v10 }
  0x40   :  { %971 = vmatpush.bf16.msrb.mxu3 %v786_v17  ;;  %v721_v26 = vpack.c.bf16 %v505_v18, %v497_v12  ;;  %848 = vmatmul.bf16.gmra.mxu0 %v2045_v19  ;;  %v354_v27 = vunpack.c.2.s8 %v154_v15  ;;  %v362_v28 = vunpack.c.3.s8 %v154_v15  ;;  %v225_v29 = vunpack.c.2.s8 %v121_v16 }
  0x41   :  { %v785_v30 = vpack.c.bf16 %v633_v22, %v625_v21  ;;  %867 = vmatmul.bf16.gmra.mxu1 %v2047_v20  ;;  %886 = vmatmul.bf16.gmra.mxu2 %v2045_v19  ;;  %v482_v31 = vcvt.s32.f32 %v226_v23  ;;  %v490_v32 = vcvt.s32.f32 %v234_v24  ;;  %v233_v33 = vunpack.c.3.s8 %v121_v16 }
  0x42   :  { %914 = vmatpush.bf16.msrb.mxu0 %v721_v26  ;;  %905 = vmatmul.bf16.gmra.mxu3 %v2047_v20  ;;  %v610_v34 = vcvt.s32.f32 %v354_v27  ;;  %v618_v35 = vcvt.s32.f32 %v362_v28  ;;  %v481_v36 = vcvt.s32.f32 %v225_v29  ;;  %v353_v37 = vunpack.c.2.s8 %v153_v25 }
  0x43   :  { %933 = vmatpush.bf16.msrb.mxu1 %v785_v30  ;;  %v714_v38 = vpack.c.bf16 %v490_v32, %v482_v31  ;;  %v489_v39 = vcvt.s32.f32 %v233_v33  ;;  %v361_v40 = vunpack.c.3.s8 %v153_v25  ;;  %v210_v41 = vunpack.c.0.s8 %v122_v10 }
  0x44   :  { %v778_v42 = vpack.c.bf16 %v618_v35, %v610_v34  ;;  %v609_v43 = vcvt.s32.f32 %v353_v37  ;;  %v218_v44 = vunpack.c.1.s8 %v122_v10  ;;  %v338_v45 = vunpack.c.0.s8 %v154_v15  ;;  %v140_v34 = vld [vmem:[%s2659_s2 + $0xe8] sm:$0xff] }
  0x45   :  { %953 = vmatpush.bf16.msrb.mxu2 %v714_v38  ;;  %v713_v46 = vpack.c.bf16 %v489_v39, %v481_v36  ;;  %v617_v47 = vcvt.s32.f32 %v361_v40  ;;  %v466_v48 = vcvt.s32.f32 %v210_v41  ;;  %v346_v50 = vunpack.c.1.s8 %v154_v15 }
  0x46   :  { %972 = vmatpush.bf16.msrb.mxu3 %v778_v42  ;;  %v474_v52 = vcvt.s32.f32 %v218_v44  ;;  %v594_v53 = vcvt.s32.f32 %v338_v45  ;;  %v209_v55 = vunpack.c.0.s8 %v121_v16  ;;  %v217_v56 = vunpack.c.1.s8 %v121_v16 }
  0x47   :  { %915 = vmatpush.bf16.msrb.mxu0 %v713_v46  ;;  %v777_v57 = vpack.c.bf16 %v617_v47, %v609_v43  ;;  %v602_v58 = vcvt.s32.f32 %v346_v50  ;;  %v337_v59 = vunpack.c.0.s8 %v153_v25  ;;  %v345_v60 = vunpack.c.1.s8 %v153_v25  ;;  %v172_v43 = vld [vmem:[%s2659_s2 + $0x1e8] sm:$0xff] }
  0x48   :  { %v706_v62 = vpack.c.bf16 %v474_v52, %v466_v48  ;;  %v465_v63 = vcvt.s32.f32 %v209_v55  ;;  %v473_v0 = vcvt.s32.f32 %v217_v56  ;;  %v194_v1 = vunpack.c.2.s8 %v114_v51  ;;  %v139_v48 = vld [vmem:[%s2659_s2 + $0xe0] sm:$0xff] }
  0x49   :  { %934 = vmatpush.bf16.msrb.mxu1 %v777_v57  ;;  %v770_v3 = vpack.c.bf16 %v602_v58, %v594_v53  ;;  %v593_v4 = vcvt.s32.f32 %v337_v59  ;;  %v601_v5 = vcvt.s32.f32 %v345_v60  ;;  %v202_v6 = vunpack.c.3.s8 %v114_v51  ;;  %v171_v55 = vld [vmem:[%s2659_s2 + $0x1e0] sm:$0xff] }
  0x4a   :  { %954 = vmatpush.bf16.msrb.mxu2 %v706_v62  ;;  %v705_v8 = vpack.c.bf16 %v473_v0, %v465_v63  ;;  %v450_v9 = vcvt.s32.f32 %v194_v1  ;;  %v322_v10 = vunpack.c.2.s8 %v146_v61  ;;  %v330_v11 = vunpack.c.3.s8 %v146_v61 }
  0x4b   :  { %973 = vmatpush.bf16.msrb.mxu3 %v770_v3  ;;  %v769_v12 = vpack.c.bf16 %v601_v5, %v593_v4  ;;  %v458_v13 = vcvt.s32.f32 %v202_v6  ;;  %v193_v14 = vunpack.c.2.s8 %v113_v2  ;;  %v201_v15 = vunpack.c.3.s8 %v113_v2 }
  0x4c   :  { %916 = vmatpush.bf16.msrb.mxu0 %v705_v8  ;;  %v578_v16 = vcvt.s32.f32 %v322_v10  ;;  %v586_v17 = vcvt.s32.f32 %v330_v11  ;;  %v321_v18 = vunpack.c.2.s8 %v145_v7  ;;  %v329_v21 = vunpack.c.3.s8 %v145_v7 }
  0x4d   :  { %935 = vmatpush.bf16.msrb.mxu1 %v769_v12  ;;  %v698_v22 = vpack.c.bf16 %v458_v13, %v450_v9  ;;  %v449_v23 = vcvt.s32.f32 %v193_v14  ;;  %v457_v24 = vcvt.s32.f32 %v201_v15  ;;  %v178_v25 = vunpack.c.0.s8 %v114_v51 }
  0x4e   :  { %v762_v26 = vpack.c.bf16 %v586_v17, %v578_v16  ;;  %v577_v27 = vcvt.s32.f32 %v321_v18  ;;  %v585_v28 = vcvt.s32.f32 %v329_v21  ;;  %v186_v29 = vunpack.c.1.s8 %v114_v51  ;;  %v132_v16 = vld [vmem:[%s2659_s2 + $0xa8] sm:$0xff] }
  0x4f   :  { %955 = vmatpush.bf16.msrb.mxu2 %v698_v22  ;;  %v697_v30 = vpack.c.bf16 %v457_v24, %v449_v23  ;;  %v434_v31 = vcvt.s32.f32 %v178_v25  ;;  %v306_v32 = vunpack.c.0.s8 %v146_v61  ;;  %v314_v33 = vunpack.c.1.s8 %v146_v61 }
  0x50   :  { %974 = vmatpush.bf16.msrb.mxu3 %v762_v26  ;;  %v761_v35 = vpack.c.bf16 %v585_v28, %v577_v27  ;;  %v442_v36 = vcvt.s32.f32 %v186_v29  ;;  %v177_v37 = vunpack.c.0.s8 %v113_v2  ;;  %v185_v38 = vunpack.c.1.s8 %v113_v2  ;;  %v164_v27 = vld [vmem:[%s2659_s2 + $0x1a8] sm:$0xff] }
  0x51   :  { %917 = vmatpush.bf16.msrb.mxu0 %v697_v30  ;;  %v562_v39 = vcvt.s32.f32 %v306_v32  ;;  %v570_v40 = vcvt.s32.f32 %v314_v33  ;;  %v305_v41 = vunpack.c.0.s8 %v145_v7  ;;  %v313_v42 = vunpack.c.1.s8 %v145_v7  ;;  %v131_v32 = vld [vmem:[%s2659_s2 + $0xa0] sm:$0xff] }
  0x52   :  { %936 = vmatpush.bf16.msrb.mxu1 %v761_v35  ;;  %v690_v44 = vpack.c.bf16 %v442_v36, %v434_v31  ;;  %v433_v45 = vcvt.s32.f32 %v177_v37  ;;  %v441_v46 = vcvt.s32.f32 %v185_v38  ;;  %v292_v47 = vunpack.c.2.s8 %v140_v34  ;;  %v163_v37 = vld [vmem:[%s2659_s2 + $0x1a0] sm:$0xff] }
  0x53   :  { %v754_v50 = vpack.c.bf16 %v570_v40, %v562_v39  ;;  %v561_v51 = vcvt.s32.f32 %v305_v41  ;;  %v569_v52 = vcvt.s32.f32 %v313_v42  ;;  %v300_v53 = vunpack.c.3.s8 %v140_v34 }
  0x54   :  { %956 = vmatpush.bf16.msrb.mxu2 %v690_v44  ;;  %v689_v56 = vpack.c.bf16 %v441_v46, %v433_v45  ;;  %v548_v57 = vcvt.s32.f32 %v292_v47  ;;  %v420_v58 = vunpack.c.2.s8 %v172_v43  ;;  %v428_v59 = vunpack.c.3.s8 %v172_v43 }
  0x55   :  { %975 = vmatpush.bf16.msrb.mxu3 %v754_v50  ;;  %v753_v60 = vpack.c.bf16 %v569_v52, %v561_v51  ;;  %v556_v61 = vcvt.s32.f32 %v300_v53  ;;  %v291_v62 = vunpack.c.2.s8 %v139_v48  ;;  %v299_v63 = vunpack.c.3.s8 %v139_v48 }
  0x56   :  { %918 = vmatpush.bf16.msrb.mxu0 %v689_v56  ;;  %v676_v0 = vcvt.s32.f32 %v420_v58  ;;  %v684_v1 = vcvt.s32.f32 %v428_v59  ;;  %v419_v2 = vunpack.c.2.s8 %v171_v55  ;;  %v427_v3 = vunpack.c.3.s8 %v171_v55 }
  0x57   :  { %937 = vmatpush.bf16.msrb.mxu1 %v753_v60  ;;  %957 = vmatmul.bf16.vlgmr.msrb.gmra.mxu2 %v1998_v49  ;;  %v748_v4 = vpack.c.bf16 %v556_v61, %v548_v57  ;;  %v547_v5 = vcvt.s32.f32 %v291_v62  ;;  %v555_v6 = vcvt.s32.f32 %v299_v63  ;;  %v276_v7 = vunpack.c.0.s8 %v140_v34 }
  0x58   :  { %976 = vmatmul.bf16.vlgmr.msrb.gmra.mxu3 %v2003_v54  ;;  %v812_v8 = vpack.c.bf16 %v684_v1, %v676_v0  ;;  %v675_v9 = vcvt.s32.f32 %v419_v2  ;;  %v683_v10 = vcvt.s32.f32 %v427_v3  ;;  %v284_v11 = vunpack.c.1.s8 %v140_v34  ;;  %v124_v0 = vld [vmem:[%s2659_s2 + $0x68] sm:$0xff] }
  0x59   :  { %919 = vmatmul.bf16.vlgmr.msrb.gmra.mxu0 %v1998_v49  ;;  %1025 = vmatpush.bf16.msra.mxu2 %v748_v4  ;;  %v747_v12 = vpack.c.bf16 %v555_v6, %v547_v5  ;;  %v532_v13 = vcvt.s32.f32 %v276_v7  ;;  %v404_v14 = vunpack.c.0.s8 %v172_v43  ;;  %v412_v15 = vunpack.c.1.s8 %v172_v43 }
  0x5a   :  { %938 = vmatmul.bf16.vlgmr.msrb.gmra.mxu1 %v2003_v54  ;;  %1044 = vmatpush.bf16.msra.mxu3 %v812_v8  ;;  %v811_v17 = vpack.c.bf16 %v683_v10, %v675_v9  ;;  %v540_v18 = vcvt.s32.f32 %v284_v11  ;;  %v275_v21 = vunpack.c.0.s8 %v139_v48  ;;  %v283_v22 = vunpack.c.1.s8 %v139_v48  ;;  %v156_v9 = vld [vmem:[%s2659_s2 + $0x168] sm:$0xff] }
  0x5b   :  { %987 = vmatpush.bf16.msra.mxu0 %v747_v12  ;;  %v660_v23 = vcvt.s32.f32 %v404_v14  ;;  %v668_v24 = vcvt.s32.f32 %v412_v15  ;;  %v403_v25 = vunpack.c.0.s8 %v171_v55  ;;  %v411_v26 = vunpack.c.1.s8 %v171_v55  ;;  %v123_v14 = vld [vmem:[%s2659_s2 + $0x60] sm:$0xff] }
  0x5c   :  { %1006 = vmatpush.bf16.msra.mxu1 %v811_v17  ;;  %v740_v28 = vpack.c.bf16 %v540_v18, %v532_v13  ;;  %v531_v29 = vcvt.s32.f32 %v275_v21  ;;  %v539_v30 = vcvt.s32.f32 %v283_v22  ;;  %v260_v31 = vunpack.c.2.s8 %v132_v16  ;;  %v155_v21 = vld [vmem:[%s2659_s2 + $0x160] sm:$0xff] }
  0x5d   :  { %v804_v33 = vpack.c.bf16 %v668_v24, %v660_v23  ;;  %v659_v34 = vcvt.s32.f32 %v403_v25  ;;  %v667_v35 = vcvt.s32.f32 %v411_v26  ;;  %v268_v36 = vunpack.c.3.s8 %v132_v16 }
  0x5e   :  { %1026 = vmatpush.bf16.msra.mxu2 %v740_v28  ;;  %v739_v38 = vpack.c.bf16 %v539_v30, %v531_v29  ;;  %v516_v39 = vcvt.s32.f32 %v260_v31  ;;  %v388_v40 = vunpack.c.2.s8 %v164_v27  ;;  %v396_v41 = vunpack.c.3.s8 %v164_v27 }
  0x5f   :  { %1045 = vmatpush.bf16.msra.mxu3 %v804_v33  ;;  %v803_v42 = vpack.c.bf16 %v667_v35, %v659_v34  ;;  %v524_v43 = vcvt.s32.f32 %v268_v36  ;;  %v259_v44 = vunpack.c.2.s8 %v131_v32  ;;  %v267_v45 = vunpack.c.3.s8 %v131_v32 }
  0x60   :  { %988 = vmatpush.bf16.msra.mxu0 %v739_v38  ;;  %v644_v46 = vcvt.s32.f32 %v388_v40  ;;  %v652_v47 = vcvt.s32.f32 %v396_v41  ;;  %v387_v48 = vunpack.c.2.s8 %v163_v37  ;;  %v395_v50 = vunpack.c.3.s8 %v163_v37 }
  0x61   :  { %1007 = vmatpush.bf16.msra.mxu1 %v803_v42  ;;  %v732_v51 = vpack.c.bf16 %v524_v43, %v516_v39  ;;  %v515_v52 = vcvt.s32.f32 %v259_v44  ;;  %v523_v53 = vcvt.s32.f32 %v267_v45  ;;  %v244_v55 = vunpack.c.0.s8 %v132_v16 }
  0x62   :  { %v796_v56 = vpack.c.bf16 %v652_v47, %v644_v46  ;;  %v643_v57 = vcvt.s32.f32 %v387_v48  ;;  %v651_v58 = vcvt.s32.f32 %v395_v50  ;;  %v252_v59 = vunpack.c.1.s8 %v132_v16  ;;  %v116_v46 = vld [vmem:[%s2659_s2 + $0x28] sm:$0xff] }
  0x63   :  { %1027 = vmatpush.bf16.msra.mxu2 %v732_v51  ;;  %v731_v60 = vpack.c.bf16 %v523_v53, %v515_v52  ;;  %v500_v61 = vcvt.s32.f32 %v244_v55  ;;  %v372_v62 = vunpack.c.0.s8 %v164_v27  ;;  %v380_v63 = vunpack.c.1.s8 %v164_v27 }
  0x64   :  { %1046 = vmatpush.bf16.msra.mxu3 %v796_v56  ;;  %v795_v1 = vpack.c.bf16 %v651_v58, %v643_v57  ;;  %v508_v2 = vcvt.s32.f32 %v252_v59  ;;  %v243_v3 = vunpack.c.0.s8 %v131_v32  ;;  %v251_v4 = vunpack.c.1.s8 %v131_v32  ;;  %v148_v57 = vld [vmem:[%s2659_s2 + $0x128] sm:$0xff] }
  0x65   :  { %989 = vmatpush.bf16.msra.mxu0 %v731_v60  ;;  %v628_v5 = vcvt.s32.f32 %v372_v62  ;;  %v636_v6 = vcvt.s32.f32 %v380_v63  ;;  %v371_v7 = vunpack.c.0.s8 %v163_v37  ;;  %v379_v8 = vunpack.c.1.s8 %v163_v37  ;;  %v115_v62 = vld [vmem:[%s2659_s2 + $0x20] sm:$0xff] }
  0x66   :  { %1008 = vmatpush.bf16.msra.mxu1 %v795_v1  ;;  %v724_v10 = vpack.c.bf16 %v508_v2, %v500_v61  ;;  %v499_v11 = vcvt.s32.f32 %v243_v3  ;;  %v507_v12 = vcvt.s32.f32 %v251_v4  ;;  %v228_v13 = vunpack.c.2.s8 %v124_v0  ;;  %v147_v3 = vld [vmem:[%s2659_s2 + $0x120] sm:$0xff] }
  0x67   :  { %v788_v15 = vpack.c.bf16 %v636_v6, %v628_v5  ;;  %v627_v16 = vcvt.s32.f32 %v371_v7  ;;  %v635_v17 = vcvt.s32.f32 %v379_v8  ;;  %962 = vmatmul.bf16.gmra.mxu2 %v2045_v19  ;;  %v236_v18 = vunpack.c.3.s8 %v124_v0 }
  0x68   :  { %1028 = vmatpush.bf16.msra.mxu2 %v724_v10  ;;  %v723_v22 = vpack.c.bf16 %v507_v12, %v499_v11  ;;  %981 = vmatmul.bf16.gmra.mxu3 %v2047_v20  ;;  %v484_v23 = vcvt.s32.f32 %v228_v13  ;;  %v356_v24 = vunpack.c.2.s8 %v156_v9  ;;  %v364_v25 = vunpack.c.3.s8 %v156_v9 }
  0x69   :  { %1047 = vmatpush.bf16.msra.mxu3 %v788_v15  ;;  %v787_v26 = vpack.c.bf16 %v635_v17, %v627_v16  ;;  %924 = vmatmul.bf16.gmra.mxu0 %v2045_v19  ;;  %v492_v27 = vcvt.s32.f32 %v236_v18  ;;  %v227_v28 = vunpack.c.2.s8 %v123_v14  ;;  %v235_v29 = vunpack.c.3.s8 %v123_v14 }
  0x6a   :  { %990 = vmatpush.bf16.msra.mxu0 %v723_v22  ;;  %943 = vmatmul.bf16.gmra.mxu1 %v2047_v20  ;;  %v612_v30 = vcvt.s32.f32 %v356_v24  ;;  %v620_v31 = vcvt.s32.f32 %v364_v25  ;;  %v355_v32 = vunpack.c.2.s8 %v155_v21  ;;  %v363_v33 = vunpack.c.3.s8 %v155_v21 }
  0x6b   :  { %1009 = vmatpush.bf16.msra.mxu1 %v787_v26  ;;  %v716_v34 = vpack.c.bf16 %v492_v27, %v484_v23  ;;  %v483_v35 = vcvt.s32.f32 %v227_v28  ;;  %v491_v36 = vcvt.s32.f32 %v235_v29  ;;  %v212_v37 = vunpack.c.0.s8 %v124_v0 }
  0x6c   :  { %v780_v38 = vpack.c.bf16 %v620_v31, %v612_v30  ;;  %v611_v39 = vcvt.s32.f32 %v355_v32  ;;  %v619_v40 = vcvt.s32.f32 %v363_v33  ;;  %v220_v41 = vunpack.c.1.s8 %v124_v0  ;;  %v142_v30 = vld [vmem:[%s2659_s2 + $0xf8] sm:$0xff] }
  0x6d   :  { %1029 = vmatpush.bf16.msra.mxu2 %v716_v34  ;;  %v715_v42 = vpack.c.bf16 %v491_v36, %v483_v35  ;;  %v468_v43 = vcvt.s32.f32 %v212_v37  ;;  %v340_v44 = vunpack.c.0.s8 %v156_v9  ;;  %v348_v45 = vunpack.c.1.s8 %v156_v9 }
  0x6e   :  { %1048 = vmatpush.bf16.msra.mxu3 %v780_v38  ;;  %v779_v47 = vpack.c.bf16 %v619_v40, %v611_v39  ;;  %v476_v48 = vcvt.s32.f32 %v220_v41  ;;  %v211_v50 = vunpack.c.0.s8 %v123_v14  ;;  %v219_v51 = vunpack.c.1.s8 %v123_v14  ;;  %v174_v39 = vld [vmem:[%s2659_s2 + $0x1f8] sm:$0xff] }
  0x6f   :  { %991 = vmatpush.bf16.msra.mxu0 %v715_v42  ;;  %v596_v52 = vcvt.s32.f32 %v340_v44  ;;  %v604_v53 = vcvt.s32.f32 %v348_v45  ;;  %v339_v55 = vunpack.c.0.s8 %v155_v21  ;;  %v347_v56 = vunpack.c.1.s8 %v155_v21  ;;  %v141_v44 = vld [vmem:[%s2659_s2 + $0xf0] sm:$0xff] }
  0x70   :  { %1010 = vmatpush.bf16.msra.mxu1 %v779_v47  ;;  %v708_v58 = vpack.c.bf16 %v476_v48, %v468_v43  ;;  %v467_v59 = vcvt.s32.f32 %v211_v50  ;;  %v475_v60 = vcvt.s32.f32 %v219_v51  ;;  %v196_v61 = vunpack.c.2.s8 %v116_v46  ;;  %v173_v50 = vld [vmem:[%s2659_s2 + $0x1f0] sm:$0xff] }
  0x71   :  { %v772_v63 = vpack.c.bf16 %v604_v53, %v596_v52  ;;  %v595_v0 = vcvt.s32.f32 %v339_v55  ;;  %v603_v1 = vcvt.s32.f32 %v347_v56  ;;  %v204_v2 = vunpack.c.3.s8 %v116_v46 }
  0x72   :  { %1030 = vmatpush.bf16.msra.mxu2 %v708_v58  ;;  %v707_v4 = vpack.c.bf16 %v475_v60, %v467_v59  ;;  %v452_v5 = vcvt.s32.f32 %v196_v61  ;;  %v324_v6 = vunpack.c.2.s8 %v148_v57  ;;  %v332_v7 = vunpack.c.3.s8 %v148_v57 }
  0x73   :  { %1049 = vmatpush.bf16.msra.mxu3 %v772_v63  ;;  %v771_v8 = vpack.c.bf16 %v603_v1, %v595_v0  ;;  %v460_v9 = vcvt.s32.f32 %v204_v2  ;;  %v195_v10 = vunpack.c.2.s8 %v115_v62  ;;  %v203_v11 = vunpack.c.3.s8 %v115_v62 }
  0x74   :  { %992 = vmatpush.bf16.msra.mxu0 %v707_v4  ;;  %v580_v12 = vcvt.s32.f32 %v324_v6  ;;  %v588_v13 = vcvt.s32.f32 %v332_v7  ;;  %v323_v14 = vunpack.c.2.s8 %v147_v3  ;;  %v331_v15 = vunpack.c.3.s8 %v147_v3 }
  0x75   :  { %1011 = vmatpush.bf16.msra.mxu1 %v771_v8  ;;  %v700_v16 = vpack.c.bf16 %v460_v9, %v452_v5  ;;  %v451_v17 = vcvt.s32.f32 %v195_v10  ;;  %v459_v18 = vcvt.s32.f32 %v203_v11  ;;  %v180_v21 = vunpack.c.0.s8 %v116_v46 }
  0x76   :  { %v764_v22 = vpack.c.bf16 %v588_v13, %v580_v12  ;;  %v579_v23 = vcvt.s32.f32 %v323_v14  ;;  %v587_v24 = vcvt.s32.f32 %v331_v15  ;;  %v188_v25 = vunpack.c.1.s8 %v116_v46  ;;  %v134_v12 = vld [vmem:[%s2659_s2 + $0xb8] sm:$0xff] }
  0x77   :  { %1031 = vmatpush.bf16.msra.mxu2 %v700_v16  ;;  %v699_v26 = vpack.c.bf16 %v459_v18, %v451_v17  ;;  %v436_v27 = vcvt.s32.f32 %v180_v21  ;;  %v308_v28 = vunpack.c.0.s8 %v148_v57  ;;  %v316_v29 = vunpack.c.1.s8 %v148_v57 }
  0x78   :  { %1050 = vmatpush.bf16.msra.mxu3 %v764_v22  ;;  %v763_v31 = vpack.c.bf16 %v587_v24, %v579_v23  ;;  %v444_v32 = vcvt.s32.f32 %v188_v25  ;;  %v179_v33 = vunpack.c.0.s8 %v115_v62  ;;  %v187_v34 = vunpack.c.1.s8 %v115_v62  ;;  %v166_v23 = vld [vmem:[%s2659_s2 + $0x1b8] sm:$0xff] }
  0x79   :  { %993 = vmatpush.bf16.msra.mxu0 %v699_v26  ;;  %v564_v35 = vcvt.s32.f32 %v308_v28  ;;  %v572_v36 = vcvt.s32.f32 %v316_v29  ;;  %v307_v37 = vunpack.c.0.s8 %v147_v3  ;;  %v315_v38 = vunpack.c.1.s8 %v147_v3  ;;  %v133_v28 = vld [vmem:[%s2659_s2 + $0xb0] sm:$0xff] }
  0x7a   :  { %1012 = vmatpush.bf16.msra.mxu1 %v763_v31  ;;  %v692_v40 = vpack.c.bf16 %v444_v32, %v436_v27  ;;  %v435_v41 = vcvt.s32.f32 %v179_v33  ;;  %v443_v42 = vcvt.s32.f32 %v187_v34  ;;  %v294_v43 = vunpack.c.2.s8 %v142_v30  ;;  %v165_v33 = vld [vmem:[%s2659_s2 + $0x1b0] sm:$0xff] }
  0x7b   :  { %v756_v45 = vpack.c.bf16 %v572_v36, %v564_v35  ;;  %v563_v46 = vcvt.s32.f32 %v307_v37  ;;  %v571_v47 = vcvt.s32.f32 %v315_v38  ;;  %v302_v48 = vunpack.c.3.s8 %v142_v30 }
  0x7c   :  { %1032 = vmatpush.bf16.msra.mxu2 %v692_v40  ;;  %v691_v51 = vpack.c.bf16 %v443_v42, %v435_v41  ;;  %v550_v52 = vcvt.s32.f32 %v294_v43  ;;  %v422_v53 = vunpack.c.2.s8 %v174_v39  ;;  %v430_v55 = vunpack.c.3.s8 %v174_v39 }
  0x7d   :  { %1051 = vmatpush.bf16.msra.mxu3 %v756_v45  ;;  %v755_v56 = vpack.c.bf16 %v571_v47, %v563_v46  ;;  %v558_v57 = vcvt.s32.f32 %v302_v48  ;;  %v293_v58 = vunpack.c.2.s8 %v141_v44  ;;  %v301_v59 = vunpack.c.3.s8 %v141_v44 }
  0x7e   :  { %994 = vmatpush.bf16.msra.mxu0 %v691_v51  ;;  %v678_v60 = vcvt.s32.f32 %v422_v53  ;;  %v686_v61 = vcvt.s32.f32 %v430_v55  ;;  %v421_v62 = vunpack.c.2.s8 %v173_v50  ;;  %v429_v63 = vunpack.c.3.s8 %v173_v50 }
  0x7f   :  { %1013 = vmatpush.bf16.msra.mxu1 %v755_v56  ;;  %1033 = vmatmul.bf16.vlgmr.msra.gmra.mxu2 %v1998_v49  ;;  %v750_v0 = vpack.c.bf16 %v558_v57, %v550_v52  ;;  %v549_v1 = vcvt.s32.f32 %v293_v58  ;;  %v557_v2 = vcvt.s32.f32 %v301_v59  ;;  %v278_v3 = vunpack.c.0.s8 %v142_v30 }
  0x80   :  { %1052 = vmatmul.bf16.vlgmr.msra.gmra.mxu3 %v2003_v54  ;;  %v814_v4 = vpack.c.bf16 %v686_v61, %v678_v60  ;;  %v677_v5 = vcvt.s32.f32 %v421_v62  ;;  %v685_v6 = vcvt.s32.f32 %v429_v63  ;;  %v286_v7 = vunpack.c.1.s8 %v142_v30  ;;  %v126_v60 = vld [vmem:[%s2659_s2 + $0x78] sm:$0xff] }
  0x81   :  { %995 = vmatmul.bf16.vlgmr.msra.gmra.mxu0 %v1998_v49  ;;  %1101 = vmatpush.bf16.msrb.mxu2 %v750_v0  ;;  %v749_v8 = vpack.c.bf16 %v557_v2, %v549_v1  ;;  %v534_v9 = vcvt.s32.f32 %v278_v3  ;;  %v406_v10 = vunpack.c.0.s8 %v174_v39  ;;  %v414_v11 = vunpack.c.1.s8 %v174_v39 }
  0x82   :  { %1014 = vmatmul.bf16.vlgmr.msra.gmra.mxu1 %v2003_v54  ;;  %1120 = vmatpush.bf16.msrb.mxu3 %v814_v4  ;;  %v813_v13 = vpack.c.bf16 %v685_v6, %v677_v5  ;;  %v542_v14 = vcvt.s32.f32 %v286_v7  ;;  %v277_v15 = vunpack.c.0.s8 %v141_v44  ;;  %v285_v16 = vunpack.c.1.s8 %v141_v44  ;;  %v158_v5 = vld [vmem:[%s2659_s2 + $0x178] sm:$0xff] }
  0x83   :  { %1063 = vmatpush.bf16.msrb.mxu0 %v749_v8  ;;  %v662_v17 = vcvt.s32.f32 %v406_v10  ;;  %v670_v18 = vcvt.s32.f32 %v414_v11  ;;  %v405_v21 = vunpack.c.0.s8 %v173_v50  ;;  %v413_v22 = vunpack.c.1.s8 %v173_v50  ;;  %v125_v10 = vld [vmem:[%s2659_s2 + $0x70] sm:$0xff] }
  0x84   :  { %1082 = vmatpush.bf16.msrb.mxu1 %v813_v13  ;;  %v742_v24 = vpack.c.bf16 %v542_v14, %v534_v9  ;;  %v533_v25 = vcvt.s32.f32 %v277_v15  ;;  %v541_v26 = vcvt.s32.f32 %v285_v16  ;;  %v262_v27 = vunpack.c.2.s8 %v134_v12  ;;  %v157_v15 = vld [vmem:[%s2659_s2 + $0x170] sm:$0xff] }
  0x85   :  { %v806_v29 = vpack.c.bf16 %v670_v18, %v662_v17  ;;  %v661_v30 = vcvt.s32.f32 %v405_v21  ;;  %v669_v31 = vcvt.s32.f32 %v413_v22  ;;  %v270_v32 = vunpack.c.3.s8 %v134_v12 }
  0x86   :  { %1102 = vmatpush.bf16.msrb.mxu2 %v742_v24  ;;  %v741_v34 = vpack.c.bf16 %v541_v26, %v533_v25  ;;  %v518_v35 = vcvt.s32.f32 %v262_v27  ;;  %v390_v36 = vunpack.c.2.s8 %v166_v23  ;;  %v398_v37 = vunpack.c.3.s8 %v166_v23 }
  0x87   :  { %1121 = vmatpush.bf16.msrb.mxu3 %v806_v29  ;;  %v805_v38 = vpack.c.bf16 %v669_v31, %v661_v30  ;;  %v526_v39 = vcvt.s32.f32 %v270_v32  ;;  %v261_v40 = vunpack.c.2.s8 %v133_v28  ;;  %v269_v41 = vunpack.c.3.s8 %v133_v28 }
  0x88   :  { %1064 = vmatpush.bf16.msrb.mxu0 %v741_v34  ;;  %v646_v42 = vcvt.s32.f32 %v390_v36  ;;  %v654_v43 = vcvt.s32.f32 %v398_v37  ;;  %v389_v44 = vunpack.c.2.s8 %v165_v33  ;;  %v397_v45 = vunpack.c.3.s8 %v165_v33 }
  0x89   :  { %1083 = vmatpush.bf16.msrb.mxu1 %v805_v38  ;;  %v734_v46 = vpack.c.bf16 %v526_v39, %v518_v35  ;;  %v517_v47 = vcvt.s32.f32 %v261_v40  ;;  %v525_v48 = vcvt.s32.f32 %v269_v41  ;;  %v246_v50 = vunpack.c.0.s8 %v134_v12 }
  0x8a   :  { %v798_v51 = vpack.c.bf16 %v654_v43, %v646_v42  ;;  %v645_v52 = vcvt.s32.f32 %v389_v44  ;;  %v653_v53 = vcvt.s32.f32 %v397_v45  ;;  %v254_v55 = vunpack.c.1.s8 %v134_v12  ;;  %v118_v42 = vld [vmem:[%s2659_s2 + $0x38] sm:$0xff] }
  0x8b   :  { %1103 = vmatpush.bf16.msrb.mxu2 %v734_v46  ;;  %v733_v56 = vpack.c.bf16 %v525_v48, %v517_v47  ;;  %v502_v57 = vcvt.s32.f32 %v246_v50  ;;  %v374_v58 = vunpack.c.0.s8 %v166_v23  ;;  %v382_v59 = vunpack.c.1.s8 %v166_v23 }
  0x8c   :  { %1122 = vmatpush.bf16.msrb.mxu3 %v798_v51  ;;  %v797_v61 = vpack.c.bf16 %v653_v53, %v645_v52  ;;  %v510_v62 = vcvt.s32.f32 %v254_v55  ;;  %v245_v63 = vunpack.c.0.s8 %v133_v28  ;;  %v253_v0 = vunpack.c.1.s8 %v133_v28  ;;  %v150_v52 = vld [vmem:[%s2659_s2 + $0x138] sm:$0xff] }
  0x8d   :  { %1065 = vmatpush.bf16.msrb.mxu0 %v733_v56  ;;  %v630_v1 = vcvt.s32.f32 %v374_v58  ;;  %v638_v2 = vcvt.s32.f32 %v382_v59  ;;  %v373_v3 = vunpack.c.0.s8 %v165_v33  ;;  %v381_v4 = vunpack.c.1.s8 %v165_v33  ;;  %v117_v58 = vld [vmem:[%s2659_s2 + $0x30] sm:$0xff] }
  0x8e   :  { %1084 = vmatpush.bf16.msrb.mxu1 %v797_v61  ;;  %v726_v6 = vpack.c.bf16 %v510_v62, %v502_v57  ;;  %v501_v7 = vcvt.s32.f32 %v245_v63  ;;  %v509_v8 = vcvt.s32.f32 %v253_v0  ;;  %v230_v9 = vunpack.c.2.s8 %v126_v60  ;;  %v149_v63 = vld [vmem:[%s2659_s2 + $0x130] sm:$0xff] }
  0x8f   :  { %v790_v11 = vpack.c.bf16 %v638_v2, %v630_v1  ;;  %v629_v12 = vcvt.s32.f32 %v373_v3  ;;  %v637_v13 = vcvt.s32.f32 %v381_v4  ;;  %1038 = vmatmul.bf16.gmra.mxu2 %v2045_v19  ;;  %v238_v14 = vunpack.c.3.s8 %v126_v60 }
  0x90   :  { %1104 = vmatpush.bf16.msrb.mxu2 %v726_v6  ;;  %v725_v16 = vpack.c.bf16 %v509_v8, %v501_v7  ;;  %1057 = vmatmul.bf16.gmra.mxu3 %v2047_v20  ;;  %v486_v17 = vcvt.s32.f32 %v230_v9  ;;  %v358_v18 = vunpack.c.2.s8 %v158_v5  ;;  %v366_v21 = vunpack.c.3.s8 %v158_v5 }
  0x91   :  { %1123 = vmatpush.bf16.msrb.mxu3 %v790_v11  ;;  %v789_v22 = vpack.c.bf16 %v637_v13, %v629_v12  ;;  %1000 = vmatmul.bf16.gmra.mxu0 %v2045_v19  ;;  %v494_v23 = vcvt.s32.f32 %v238_v14  ;;  %v229_v24 = vunpack.c.2.s8 %v125_v10  ;;  %v237_v25 = vunpack.c.3.s8 %v125_v10 }
  0x92   :  { %1066 = vmatpush.bf16.msrb.mxu0 %v725_v16  ;;  %1019 = vmatmul.bf16.gmra.mxu1 %v2047_v20  ;;  %v614_v26 = vcvt.s32.f32 %v358_v18  ;;  %v622_v27 = vcvt.s32.f32 %v366_v21  ;;  %v357_v28 = vunpack.c.2.s8 %v157_v15  ;;  %v365_v29 = vunpack.c.3.s8 %v157_v15 }
  0x93   :  { %1085 = vmatpush.bf16.msrb.mxu1 %v789_v22  ;;  %v718_v30 = vpack.c.bf16 %v494_v23, %v486_v17  ;;  %v485_v31 = vcvt.s32.f32 %v229_v24  ;;  %v493_v32 = vcvt.s32.f32 %v237_v25  ;;  %v214_v33 = vunpack.c.0.s8 %v126_v60 }
  0x94   :  { %v782_v34 = vpack.c.bf16 %v622_v27, %v614_v26  ;;  %v613_v35 = vcvt.s32.f32 %v357_v28  ;;  %v621_v36 = vcvt.s32.f32 %v365_v29  ;;  %v222_v37 = vunpack.c.1.s8 %v126_v60 }
  0x95   :  { %1105 = vmatpush.bf16.msrb.mxu2 %v718_v30  ;;  %v717_v38 = vpack.c.bf16 %v493_v32, %v485_v31  ;;  %v470_v39 = vcvt.s32.f32 %v214_v33  ;;  %v342_v40 = vunpack.c.0.s8 %v158_v5  ;;  %v350_v41 = vunpack.c.1.s8 %v158_v5 }
  0x96   :  { %1124 = vmatpush.bf16.msrb.mxu3 %v782_v34  ;;  %v781_v43 = vpack.c.bf16 %v621_v36, %v613_v35  ;;  %v478_v44 = vcvt.s32.f32 %v222_v37  ;;  %v213_v45 = vunpack.c.0.s8 %v125_v10  ;;  %v221_v46 = vunpack.c.1.s8 %v125_v10 }
  0x97   :  { %1067 = vmatpush.bf16.msrb.mxu0 %v717_v38  ;;  %v598_v47 = vcvt.s32.f32 %v342_v40  ;;  %v606_v48 = vcvt.s32.f32 %v350_v41  ;;  %v341_v50 = vunpack.c.0.s8 %v157_v15  ;;  %v349_v51 = vunpack.c.1.s8 %v157_v15 }
  0x98   :  { %1086 = vmatpush.bf16.msrb.mxu1 %v781_v43  ;;  %v710_v53 = vpack.c.bf16 %v478_v44, %v470_v39  ;;  %v469_v55 = vcvt.s32.f32 %v213_v45  ;;  %v477_v56 = vcvt.s32.f32 %v221_v46  ;;  %v198_v57 = vunpack.c.2.s8 %v118_v42 }
  0x99   :  { %v774_v59 = vpack.c.bf16 %v606_v48, %v598_v47  ;;  %v597_v60 = vcvt.s32.f32 %v341_v50  ;;  %v605_v61 = vcvt.s32.f32 %v349_v51  ;;  %v206_v62 = vunpack.c.3.s8 %v118_v42 }
  0x9a   :  { %1106 = vmatpush.bf16.msrb.mxu2 %v710_v53  ;;  %v709_v0 = vpack.c.bf16 %v477_v56, %v469_v55  ;;  %v454_v1 = vcvt.s32.f32 %v198_v57  ;;  %v326_v2 = vunpack.c.2.s8 %v150_v52  ;;  %v334_v3 = vunpack.c.3.s8 %v150_v52 }
  0x9b   :  { %1125 = vmatpush.bf16.msrb.mxu3 %v774_v59  ;;  %v773_v4 = vpack.c.bf16 %v605_v61, %v597_v60  ;;  %v462_v5 = vcvt.s32.f32 %v206_v62  ;;  %v197_v6 = vunpack.c.2.s8 %v117_v58  ;;  %v205_v7 = vunpack.c.3.s8 %v117_v58 }
  0x9c   :  { %1068 = vmatpush.bf16.msrb.mxu0 %v709_v0  ;;  %v582_v8 = vcvt.s32.f32 %v326_v2  ;;  %v590_v9 = vcvt.s32.f32 %v334_v3  ;;  %v325_v10 = vunpack.c.2.s8 %v149_v63  ;;  %v333_v11 = vunpack.c.3.s8 %v149_v63 }
  0x9d   :  { %1087 = vmatpush.bf16.msrb.mxu1 %v773_v4  ;;  %v702_v12 = vpack.c.bf16 %v462_v5, %v454_v1  ;;  %v453_v13 = vcvt.s32.f32 %v197_v6  ;;  %v461_v14 = vcvt.s32.f32 %v205_v7  ;;  %v182_v15 = vunpack.c.0.s8 %v118_v42 }
  0x9e   :  { %v766_v16 = vpack.c.bf16 %v590_v9, %v582_v8  ;;  %v581_v17 = vcvt.s32.f32 %v325_v10  ;;  %v589_v18 = vcvt.s32.f32 %v333_v11  ;;  %v190_v21 = vunpack.c.1.s8 %v118_v42 }
  0x9f   :  { %1107 = vmatpush.bf16.msrb.mxu2 %v702_v12  ;;  %v701_v22 = vpack.c.bf16 %v461_v14, %v453_v13  ;;  %v438_v23 = vcvt.s32.f32 %v182_v15  ;;  %v310_v24 = vunpack.c.0.s8 %v150_v52  ;;  %v318_v25 = vunpack.c.1.s8 %v150_v52 }
  0xa0   :  { %1126 = vmatpush.bf16.msrb.mxu3 %v766_v16  ;;  %v765_v26 = vpack.c.bf16 %v589_v18, %v581_v17  ;;  %v446_v27 = vcvt.s32.f32 %v190_v21  ;;  %v181_v28 = vunpack.c.0.s8 %v117_v58  ;;  %v189_v29 = vunpack.c.1.s8 %v117_v58 }
  0xa1   :  { %1069 = vmatpush.bf16.msrb.mxu0 %v701_v22  ;;  %v566_v30 = vcvt.s32.f32 %v310_v24  ;;  %v574_v31 = vcvt.s32.f32 %v318_v25  ;;  %v309_v32 = vunpack.c.0.s8 %v149_v63  ;;  %v317_v33 = vunpack.c.1.s8 %v149_v63 }
  0xa2   :  { %1088 = vmatpush.bf16.msrb.mxu1 %v765_v26  ;;  %v694_v34 = vpack.c.bf16 %v446_v27, %v438_v23  ;;  %v437_v35 = vcvt.s32.f32 %v181_v28  ;;  %v445_v36 = vcvt.s32.f32 %v189_v29  ;;  %v2187_v45 = vstv %s2657_s0 }
  0xa3   :  { %v758_v37 = vpack.c.bf16 %v574_v31, %v566_v30  ;;  %v565_v38 = vcvt.s32.f32 %v309_v32  ;;  %v573_v39 = vcvt.s32.f32 %v317_v33  ;;  %vm27_vm0 = vcmask 7168  }
  0xa4   :  { %1108 = vmatpush.bf16.msrb.mxu2 %v694_v34  ;;  %v693_v40 = vpack.c.bf16 %v445_v36, %v437_v35 }
  0xa5   :  { %1127 = vmatpush.bf16.msrb.mxu3 %v758_v37  ;;  %v757_v41 = vpack.c.bf16 %v573_v39, %v565_v38 }
  0xa6   :  { %1070 = vmatpush.bf16.msrb.mxu0 %v693_v40 }
  0xa7   :  { %1089 = vmatpush.bf16.msrb.mxu1 %v757_v41  ;;  %1109 = vmatmul.bf16.vlgmr.msrb.gmra.mxu2 %v1998_v49 }
  0xa8   :  { %1128 = vmatmul.bf16.vlgmr.msrb.gmra.mxu3 %v2003_v54 }
  0xa9   :  { %1071 = vmatmul.bf16.vlgmr.msrb.gmra.mxu0 %v1998_v49 }
  0xaa   :  { %1090 = vmatmul.bf16.vlgmr.msrb.gmra.mxu1 %v2003_v54 }
  0xab   :  { %v844_v42 = vpop.f32.mrf.mxu0 }
  0xac   :  { %v863_v43 = vpop.f32.mrf.mxu1 }
  0xad   :  { %v864_v44 = vadd.f32 %v863_v43, %v844_v42 }
  0xaf   :  { %v2190_v46 = vmul.f32 %v2187_v45, %v864_v44 }
  0xb1   :  { %1272 = vst [vmem:[#allocation6] sm:$0xff] %v2190_v46 }
  0xb3   :  { %v882_v47 = vpop.f32.mrf.mxu2  ;;  %v846_v48 = vpop.f32.mrf.mxu0 }
  0xb4   :  { %v901_v50 = vpop.f32.mrf.mxu3  ;;  %v865_v51 = vpop.f32.mrf.mxu1 }
  0xb5   :  { %v902_v49 = vadd.f32 %v901_v50, %v882_v47  ;;  %v866_v52 = vadd.f32 %v865_v51, %v846_v48 }
  0xb7   :  { %1114 = vmatmul.bf16.gmra.mxu2 %v2045_v19  ;;  %v2197_v54 = vmul.f32 %v2187_v45, %v902_v49  ;;  %v2200_v53 = vmul.f32 %v2187_v45, %v866_v52 }
  0xb8   :  { %1133 = vmatmul.bf16.gmra.mxu3 %v2047_v20 }
  0xb9   :  { %1076 = vmatmul.bf16.gmra.mxu0 %v2045_v19  ;;  %1273 = vst [vmem:[#allocation6 + $0x8] sm:$0xff] %v2197_v54 }
  0xba   :  { %1095 = vmatmul.bf16.gmra.mxu1 %v2047_v20  ;;  %1280 = vst [vmem:[#allocation6 + $0x40] sm:$0xff] %v2200_v53 }
  0xbb   :  { %v884_v55 = vpop.f32.mrf.mxu2 }
  0xbc   :  { %v903_v56 = vpop.f32.mrf.mxu3 }
  0xbd   :  { %v904_v57 = vadd.f32 %v903_v56, %v884_v55  ;;  %v849_v58 = vpop.f32.mrf.mxu0 }
  0xbe   :  { %v868_v59 = vpop.f32.mrf.mxu1 }
  0xbf   :  { %v869_v60 = vadd.f32 %v868_v59, %v849_v58  ;;  %v2206_v19 = vmul.f32 %v2187_v45, %v904_v57 }
  0xc1   :  { %1281 = vst [vmem:[#allocation6 + $0x48] sm:$0xff] %v2206_v19  ;;  %v2210_v61 = vmul.f32 %v2187_v45, %v869_v60 }
  0xc3   :  { %1288 = vst [vmem:[#allocation6 + $0x80] sm:$0xff] %v2210_v61 }
  0xc4   :  { %v887_v62 = vpop.f32.mrf.mxu2 }
  0xc5   :  { %v906_v20 = vpop.f32.mrf.mxu3  ;;  %v851_v63 = vpop.f32.mrf.mxu0 }
  0xc6   :  { %v907_v0 = vadd.f32 %v906_v20, %v887_v62  ;;  %v870_v1 = vpop.f32.mrf.mxu1 }
  0xc7   :  { %v871_v2 = vadd.f32 %v870_v1, %v851_v63 }
  0xc8   :  { %v2214_v3 = vmul.f32 %v2187_v45, %v907_v0 }
  0xc9   :  { %v2217_v4 = vmul.f32 %v2187_v45, %v871_v2 }
  0xca   :  { %1289 = vst [vmem:[#allocation6 + $0x88] sm:$0xff] %v2214_v3 }
  0xcb   :  { %1296 = vst [vmem:[#allocation6 + $0xc0] sm:$0xff] %v2217_v4 }
  0xcc   :  { %v889_v5 = vpop.f32.mrf.mxu2 }
  0xcd   :  { %v908_v6 = vpop.f32.mrf.mxu3 }
  0xce   :  { %v909_v7 = vadd.f32 %v908_v6, %v889_v5 }
  0xd0   :  { %v2222_v8 = vmul.f32 %v2187_v45, %v909_v7 }
  0xd2   :  { %1297 = vst [vmem:[#allocation6 + $0xc8] sm:$0xff] %v2222_v8 }
  0xd6   :  { %v920_v9 = vpop.f32.mrf.mxu0 }
  0xd7   :  { %v939_v10 = vpop.f32.mrf.mxu1 }
  0xd8   :  { %v940_v11 = vadd.f32 %v939_v10, %v920_v9 }
  0xda   :  { %v958_v12 = vpop.f32.mrf.mxu2  ;;  %v2226_v14 = vmul.f32 %v2187_v45, %v940_v11 }
  0xdb   :  { %v977_v13 = vpop.f32.mrf.mxu3 }
  0xdc   :  { %v978_v15 = vadd.f32 %v977_v13, %v958_v12  ;;  %1274 = vst [vmem:[#allocation6 + $0x10] sm:$0xff] %v2226_v14 }
  0xde   :  { %v922_v16 = vpop.f32.mrf.mxu0  ;;  %v2230_v18 = vmul.f32 %v2187_v45, %v978_v15 }
  0xdf   :  { %v941_v17 = vpop.f32.mrf.mxu1 }
  0xe0   :  { %v942_v21 = vadd.f32 %v941_v17, %v922_v16  ;;  %1275 = vst [vmem:[#allocation6 + $0x18] sm:$0xff] %v2230_v18 }
  0xe2   :  { %v960_v22 = vpop.f32.mrf.mxu2  ;;  %v2234_v24 = vmul.f32 %v2187_v45, %v942_v21 }
  0xe3   :  { %v979_v23 = vpop.f32.mrf.mxu3 }
  0xe4   :  { %v980_v25 = vadd.f32 %v979_v23, %v960_v22  ;;  %1282 = vst [vmem:[#allocation6 + $0x50] sm:$0xff] %v2234_v24  ;;  %v1308_v23 = vmax.f32 %v2190_v46, %v2197_v54 }
  0xe6   :  { %v925_v26 = vpop.f32.mrf.mxu0  ;;  %v2238_v28 = vmul.f32 %v2187_v45, %v980_v25 }
  0xe7   :  { %v944_v27 = vpop.f32.mrf.mxu1 }
  0xe8   :  { %v945_v29 = vadd.f32 %v944_v27, %v925_v26  ;;  %1283 = vst [vmem:[#allocation6 + $0x58] sm:$0xff] %v2238_v28  ;;  %v1309_v27 = vmax.f32 %v1308_v23, %v2226_v14 }
  0xea   :  { %v963_v30 = vpop.f32.mrf.mxu2  ;;  %v2242_v32 = vmul.f32 %v2187_v45, %v945_v29 }
  0xeb   :  { %v982_v31 = vpop.f32.mrf.mxu3 }
  0xec   :  { %v983_v33 = vadd.f32 %v982_v31, %v963_v30  ;;  %1290 = vst [vmem:[#allocation6 + $0x90] sm:$0xff] %v2242_v32  ;;  %v1310_v30 = vmax.f32 %v1309_v27, %v2230_v18  ;;  %v1335_v27 = vmax.f32 %v2217_v4, %v2222_v8 }
  0xee   :  { %v927_v34 = vpop.f32.mrf.mxu0  ;;  %v2246_v36 = vmul.f32 %v2187_v45, %v983_v33 }
  0xef   :  { %v946_v35 = vpop.f32.mrf.mxu1 }
  0xf0   :  { %v947_v37 = vadd.f32 %v946_v35, %v927_v34  ;;  %1291 = vst [vmem:[#allocation6 + $0x98] sm:$0xff] %v2246_v36 }
  0xf2   :  { %v965_v38 = vpop.f32.mrf.mxu2  ;;  %v2250_v40 = vmul.f32 %v2187_v45, %v947_v37 }
  0xf3   :  { %v984_v39 = vpop.f32.mrf.mxu3 }
  0xf4   :  { %v985_v41 = vadd.f32 %v984_v39, %v965_v38  ;;  %1298 = vst [vmem:[#allocation6 + $0xd0] sm:$0xff] %v2250_v40  ;;  %v1317_v39 = vmax.f32 %v2200_v53, %v2206_v19 }
  0xf6   :  { %v2254_v42 = vmul.f32 %v2187_v45, %v985_v41 }
  0xf8   :  { %1299 = vst [vmem:[#allocation6 + $0xd8] sm:$0xff] %v2254_v42 }
  0xfe   :  { %v996_v43 = vpop.f32.mrf.mxu0 }
  0xff   :  { %v1015_v44 = vpop.f32.mrf.mxu1 }
 0x100   :  { %v1016_v47 = vadd.f32 %v1015_v44, %v996_v43 }
 0x102   :  { %v1034_v48 = vpop.f32.mrf.mxu2  ;;  %v2258_v51 = vmul.f32 %v2187_v45, %v1016_v47 }
 0x103   :  { %v1053_v50 = vpop.f32.mrf.mxu3 }
 0x104   :  { %v1054_v49 = vadd.f32 %v1053_v50, %v1034_v48  ;;  %1276 = vst [vmem:[#allocation6 + $0x20] sm:$0xff] %v2258_v51  ;;  %v1311_v35 = vmax.f32 %v1310_v30, %v2258_v51  ;;  %v1318_v48 = vmax.f32 %v1317_v39, %v2234_v24 }
 0x106   :  { %v998_v52 = vpop.f32.mrf.mxu0  ;;  %v2262_v56 = vmul.f32 %v2187_v45, %v1054_v49 }
 0x107   :  { %v1017_v55 = vpop.f32.mrf.mxu1 }
 0x108   :  { %v1018_v57 = vadd.f32 %v1017_v55, %v998_v52  ;;  %1277 = vst [vmem:[#allocation6 + $0x28] sm:$0xff] %v2262_v56  ;;  %v1312_v38 = vmax.f32 %v1311_v35, %v2262_v56  ;;  %v1319_v52 = vmax.f32 %v1318_v48, %v2238_v28  ;;  %v1336_v35 = vmax.f32 %v1335_v27, %v2250_v40  ;;  %v2414_v27 = vld [vmem:[%s2660_s3 + $0x8] sm:$0xff] }
 0x109   :  { %2671 = vst [vmem:[#allocation10_spill] sm:$0xff] %v2414_v27 }
 0x10a   :  { %v1036_v58 = vpop.f32.mrf.mxu2  ;;  %v2266_v60 = vmul.f32 %v2187_v45, %v1018_v57  ;;  %v1337_v39 = vmax.f32 %v1336_v35, %v2254_v42  ;;  %v2434_v35 = vld [vmem:[%s2660_s3 + $0x18] sm:$0xff] }
 0x10b   :  { %v1055_v59 = vpop.f32.mrf.mxu3  ;;  %2674 = vst [vmem:[#allocation13_spill] sm:$0xff] %v2434_v35 }
 0x10c   :  { %v1056_v62 = vadd.f32 %v1055_v59, %v1036_v58  ;;  %1284 = vst [vmem:[#allocation6 + $0x60] sm:$0xff] %v2266_v60  ;;  %v1320_v59 = vmax.f32 %v1319_v52, %v2266_v60 }
 0x10e   :  { %v1001_v20 = vpop.f32.mrf.mxu0  ;;  %v2270_v0 = vmul.f32 %v2187_v45, %v1056_v62 }
 0x10f   :  { %v1020_v63 = vpop.f32.mrf.mxu1 }
 0x110   :  { %v1021_v1 = vadd.f32 %v1020_v63, %v1001_v20  ;;  %1285 = vst [vmem:[#allocation6 + $0x68] sm:$0xff] %v2270_v0  ;;  %v1321_v20 = vmax.f32 %v1320_v59, %v2270_v0  ;;  %v1326_v63 = vmax.f32 %v2210_v61, %v2214_v3  ;;  %v2663_v59 = vmov 0.0  }
 0x111   :  { %32 = vst.msk [vmem:[#allocation3] sm:$0xff] %vm27_vm0, %v2663_v59 }
 0x112   :  { %v1039_v2 = vpop.f32.mrf.mxu2  ;;  %v2274_v6 = vmul.f32 %v2187_v45, %v1021_v1  ;;  %33 = vst.msk [vmem:[#allocation3 + $0x8] sm:$0xff] %vm27_vm0, %v2663_v59 }
 0x113   :  { %v1058_v5 = vpop.f32.mrf.mxu3  ;;  %34 = vst.msk [vmem:[#allocation3 + $0x10] sm:$0xff] %vm27_vm0, %v2663_v59 }
 0x114   :  { %v1059_v7 = vadd.f32 %v1058_v5, %v1039_v2  ;;  %1292 = vst [vmem:[#allocation6 + $0xa0] sm:$0xff] %v2274_v6 }
 0x115   :  { %35 = vst.msk [vmem:[#allocation3 + $0x18] sm:$0xff] %vm27_vm0, %v2663_v59 }
 0x116   :  { %v1003_v9 = vpop.f32.mrf.mxu0  ;;  %v2278_v11 = vmul.f32 %v2187_v45, %v1059_v7  ;;  %36 = vst.msk [vmem:[#allocation4] sm:$0xff] %vm27_vm0, %v2663_v59 }
 0x117   :  { %v1022_v10 = vpop.f32.mrf.mxu1  ;;  %37 = vst.msk [vmem:[#allocation4 + $0x8] sm:$0xff] %vm27_vm0, %v2663_v59 }
 0x118   :  { %v1023_v12 = vadd.f32 %v1022_v10, %v1003_v9  ;;  %1293 = vst [vmem:[#allocation6 + $0xa8] sm:$0xff] %v2278_v11  ;;  %v1327_v9 = vmax.f32 %v1326_v63, %v2242_v32 }
 0x119   :  { %38 = vst.msk [vmem:[#allocation4 + $0x10] sm:$0xff] %vm27_vm0, %v2663_v59 }
 0x11a   :  { %v1041_v13 = vpop.f32.mrf.mxu2  ;;  %v2282_v16 = vmul.f32 %v2187_v45, %v1023_v12  ;;  %39 = vst.msk [vmem:[#allocation4 + $0x18] sm:$0xff] %vm27_vm0, %v2663_v59 }
 0x11b   :  { %v1060_v15 = vpop.f32.mrf.mxu3 }
 0x11c   :  { %v1061_v17 = vadd.f32 %v1060_v15, %v1041_v13  ;;  %1300 = vst [vmem:[#allocation6 + $0xe0] sm:$0xff] %v2282_v16  ;;  %v1328_v13 = vmax.f32 %v1327_v9, %v2246_v36  ;;  %v1338_v48 = vmax.f32 %v1337_v39, %v2282_v16 }
 0x11e   :  { %v2286_v21 = vmul.f32 %v2187_v45, %v1061_v17  ;;  %v1329_v23 = vmax.f32 %v1328_v13, %v2274_v6 }
 0x120   :  { %1301 = vst [vmem:[#allocation6 + $0xe8] sm:$0xff] %v2286_v21 }
 0x126   :  { %v1072_v22 = vpop.f32.mrf.mxu0 }
 0x127   :  { %v1091_v25 = vpop.f32.mrf.mxu1 }
 0x128   :  { %v1092_v26 = vadd.f32 %v1091_v25, %v1072_v22 }
 0x12a   :  { %v1110_v29 = vpop.f32.mrf.mxu2  ;;  %v2294_v33 = vmul.f32 %v2187_v45, %v1092_v26  ;;  %v1330_v26 = vmax.f32 %v1329_v23, %v2278_v11 }
 0x12b   :  { %v1129_v31 = vpop.f32.mrf.mxu3 }
 0x12c   :  { %v1130_v34 = vadd.f32 %v1129_v31, %v1110_v29  ;;  %1278 = vst [vmem:[#allocation6 + $0x30] sm:$0xff] %v2294_v33  ;;  %v1313_v47 = vmax.f32 %v1312_v38, %v2294_v33 }
 0x12e   :  { %v1074_v37 = vpop.f32.mrf.mxu0  ;;  %v2302_v43 = vmul.f32 %v2187_v45, %v1130_v34 }
 0x12f   :  { %v1093_v41 = vpop.f32.mrf.mxu1 }
 0x130   :  { %v1094_v44 = vadd.f32 %v1093_v41, %v1074_v37  ;;  %1279 = vst [vmem:[#allocation6 + $0x38] sm:$0xff] %v2302_v43  ;;  %v1314_v49 = vmax.f32 %v1313_v47, %v2302_v43 }
 0x132   :  { %v1112_v50 = vpop.f32.mrf.mxu2  ;;  %v2310_v57 = vmul.f32 %v2187_v45, %v1094_v44  ;;  %1315 = vmax.xlane.f32.xlu0 %v1314_v49 }
 0x133   :  { %v1131_v55 = vpop.f32.mrf.mxu3 }
 0x134   :  { %v1132_v58 = vadd.f32 %v1131_v55, %v1112_v50  ;;  %1286 = vst [vmem:[#allocation6 + $0x70] sm:$0xff] %v2310_v57  ;;  %v1322_v7 = vmax.f32 %v1321_v20, %v2310_v57  ;;  %v1339_v50 = vmax.f32 %v1338_v48, %v2286_v21 }
 0x136   :  { %v1077_v62 = vpop.f32.mrf.mxu0  ;;  %v2318_v2 = vmul.f32 %v2187_v45, %v1132_v58  ;;  %v1896_v58 = vmov -inf  }
 0x137   :  { %v1096_v1 = vpop.f32.mrf.mxu1  ;;  %28 = vst.msk [vmem:[#allocation2] sm:$0xff] %vm27_vm0, %v1896_v58 }
 0x138   :  { %v1097_v5 = vadd.f32 %v1096_v1, %v1077_v62  ;;  %1287 = vst [vmem:[#allocation6 + $0x78] sm:$0xff] %v2318_v2  ;;  %v1323_v12 = vmax.f32 %v1322_v7, %v2318_v2 }
 0x139   :  { %29 = vst.msk [vmem:[#allocation2 + $0x8] sm:$0xff] %vm27_vm0, %v1896_v58 }
 0x13a   :  { %v1115_v10 = vpop.f32.mrf.mxu2  ;;  %v2326_v17 = vmul.f32 %v2187_v45, %v1097_v5  ;;  %1324 = vmax.xlane.f32.xlu0 %v1323_v12  ;;  %30 = vst.msk [vmem:[#allocation2 + $0x10] sm:$0xff] %vm27_vm0, %v1896_v58 }
 0x13b   :  { %v1134_v15 = vpop.f32.mrf.mxu3  ;;  %31 = vst.msk [vmem:[#allocation2 + $0x18] sm:$0xff] %vm27_vm0, %v1896_v58 }
 0x13c   :  { %v1135_v22 = vadd.f32 %v1134_v15, %v1115_v10  ;;  %1294 = vst [vmem:[#allocation6 + $0xb0] sm:$0xff] %v2326_v17  ;;  %v1331_v34 = vmax.f32 %v1330_v26, %v2326_v17  ;;  %v2398_v15 = vld [vmem:[%s2660_s3] sm:$0xff] }
 0x13e   :  { %v1079_v25 = vpop.f32.mrf.mxu0  ;;  %v2334_v30 = vmul.f32 %v2187_v45, %v1135_v22  ;;  %v2373_v62 = vld [vmem:[#allocation2] sm:$0xff] }
 0x13f   :  { %v1098_v29 = vpop.f32.mrf.mxu1 }
 0x140   :  { %v1099_v31 = vadd.f32 %v1098_v29, %v1079_v25  ;;  %1295 = vst [vmem:[#allocation6 + $0xb8] sm:$0xff] %v2334_v30  ;;  %v1332_v38 = vmax.f32 %v1331_v34, %v2334_v30  ;;  %v2383_v5 = vld [vmem:[#allocation2 + $0x8] sm:$0xff]  ;;  %v2428_v34 = vld [vmem:[%s2660_s3 + $0x10] sm:$0xff] }
 0x141   :  { %v2393_v12 = vld [vmem:[#allocation2 + $0x10] sm:$0xff]  ;;  %2673 = vst [vmem:[#allocation12_spill] sm:$0xff] %v2428_v34 }
 0x142   :  { %v1117_v37 = vpop.f32.mrf.mxu2  ;;  %v2342_v44 = vmul.f32 %v2187_v45, %v1099_v31  ;;  %1333 = vmax.xlane.f32.xlu1 %v1332_v38  ;;  %v2409_v25 = vld [vmem:[#allocation2 + $0x18] sm:$0xff] }
 0x143   :  { %v1136_v41 = vpop.f32.mrf.mxu3  ;;  %2670 = vst [vmem:[#allocation9_spill] sm:$0xff] %v2409_v25 }
 0x144   :  { %v1137_v47 = vadd.f32 %v1136_v41, %v1117_v37  ;;  %1302 = vst [vmem:[#allocation6 + $0xf0] sm:$0xff] %v2342_v44  ;;  %v1340_v52 = vmax.f32 %v1339_v50, %v2342_v44 }
 0x146   :  { %v2348_v49 = vmul.f32 %v2187_v45, %v1137_v47  ;;  %v1898_v45 = vmov 0  }
 0x147   :  { %1787 = vset.pattern.permute.xlu2 %v1898_v45  ;;  %1788 = vset.pattern.permute.xlu0 %v1898_v45 }
 0x148   :  { %1303 = vst [vmem:[#allocation6 + $0xf8] sm:$0xff] %v2348_v49  ;;  %v1341_v55 = vmax.f32 %v1340_v52, %v2348_v49  ;;  %1789 = vset.pattern.permute.xlu1 %v1898_v45  ;;  %v1537_v45 = vlaneseq }
 0x149   :  { %1747 = dma.vmem_to_hbm [thread:$0]  %s1740_s19, 4096, %s1742_s17, [#allocation7], %s1900_s20, %s1900_s20, %s1901_s21  }
 0x14a   :  { %1342 = vmax.xlane.f32.xlu1 %v1341_v55  ;;  %v2444_v59 = vand.u32 127, %v1537_v45 }
 0x1a5   :  { %v1316_v20 = vpop.xlane.xlu0 %1315 }
 0x1a6   :  { %v2376_v63 = vmax.f32 %v2373_v62, %v1316_v20 }
 0x1a8   :  { %1533 = vst.msk [vmem:[#allocation2] sm:$0xff] %vm27_vm0, %v2376_v63  ;;  %1374 = vperm.xlu2 %1787, %v2376_v63  }
 0x1ad   :  { %v1325_v7 = vpop.xlane.xlu0 %1324 }
 0x1ae   :  { %v2386_v9 = vmax.f32 %v2383_v5, %v1325_v7 }
 0x1b0   :  { %1534 = vst.msk [vmem:[#allocation2 + $0x8] sm:$0xff] %vm27_vm0, %v2386_v9  ;;  %1379 = vperm.xlu2 %1787, %v2386_v9  }
 0x1b5   :  { %v1334_v13 = vpop.xlane.xlu1 %1333 }
 0x1b6   :  { %v2401_v22 = vmax.f32 %v2393_v12, %v1334_v13 }
 0x1b8   :  { %1535 = vst.msk [vmem:[#allocation2 + $0x10] sm:$0xff] %vm27_vm0, %v2401_v22  ;;  %1384 = vperm.xlu0 %1788, %v2401_v22   ;;  %1561 = vperm.xlu2 %1787, %v2398_v15  }
 0x1bd   :  { %v1343_v26 = vpop.xlane.xlu1 %1342 }
 0x1be   :  { %v2417_v29 = vmax.f32 %v2409_v25, %v1343_v26  ;;  %v2473_v25 = vadd.s32 512, %v2444_v59 }
 0x1c0   :  { %2672 = vst [vmem:[#allocation11_spill] sm:$0xff] %v2417_v29  ;;  %1389 = vperm.xlu1 %1789, %v2417_v29   ;;  %1564 = vperm.xlu2 %1787, %v2414_v27  }
 0x1c1   :  { %1536 = vst.msk [vmem:[#allocation2 + $0x18] sm:$0xff] %vm27_vm0, %v2417_v29 }
 0x1c8   :  { %1567 = vperm.xlu2 %1787, %v2428_v34  }
 0x1d0   :  { %1570 = vperm.xlu2 %1787, %v2434_v35  }
 0x202   :  { %v1375_v37 = vpop.permute.xlu2 %1374 }
 0x203   :  { %v1392_v38 = vsub.f32 %v2190_v46, %v1375_v37  ;;  %v1393_v39 = vsub.f32 %v2197_v54, %v1375_v37  ;;  %v1394_v41 = vsub.f32 %v2226_v14, %v1375_v37  ;;  %v1395_v47 = vsub.f32 %v2230_v18, %v1375_v37 }
 0x204   :  { %v1396_v52 = vsub.f32 %v2258_v51, %v1375_v37  ;;  %v1397_v55 = vsub.f32 %v2262_v56, %v1375_v37  ;;  %v1398_v7 = vsub.f32 %v2294_v33, %v1375_v37  ;;  %v1399_v23 = vsub.f32 %v2302_v43, %v1375_v37 }
 0x205   :  { %v1424_v48 = vmul.f32 1.442695, %v1392_v38  ;;  %v1426_v50 = vmul.f32 1.442695, %v1393_v39  ;;  %v1428_v58 = vmul.f32 1.442695, %v1394_v41 }
 0x206   :  { %v1430_v20 = vmul.f32 1.442695, %v1395_v47  ;;  %v1432_v13 = vmul.f32 1.442695, %v1396_v52  ;;  %v1434_v31 = vmul.f32 1.442695, %v1397_v55 }
 0x207   :  { %1790 = vpow2.f32 %v1424_v48  ;;  %v1436_v52 = vmul.f32 1.442695, %v1398_v7  ;;  %v1438_v1 = vmul.f32 1.442695, %v1399_v23  ;;  %v2453_v37 = vadd.s32 128, %v2444_v59 }
 0x208   :  { %1792 = vpow2.f32 %v1426_v50  ;;  %v2460_v23 = vadd.s32 256, %v2444_v59 }
 0x209   :  { %1794 = vpow2.f32 %v1428_v58 }
 0x20a   :  { %v1380_v26 = vpop.permute.xlu2 %1379  ;;  %1796 = vpow2.f32 %v1430_v20 }
 0x20b   :  { %v1400_v38 = vsub.f32 %v2200_v53, %v1380_v26  ;;  %v1401_v39 = vsub.f32 %v2206_v19, %v1380_v26  ;;  %v1402_v41 = vsub.f32 %v2234_v24, %v1380_v26  ;;  %v1403_v48 = vsub.f32 %v2238_v28, %v1380_v26 }
 0x20c   :  { %1798 = vpow2.f32 %v1432_v13  ;;  %v1404_v55 = vsub.f32 %v2266_v60, %v1380_v26  ;;  %v1405_v20 = vsub.f32 %v2270_v0, %v1380_v26 }
 0x20d   :  { %v1791_v47 = vpop.eup %1790  ;;  %v1440_v50 = vmul.f32 1.442695, %v1400_v38  ;;  %v1442_v10 = vmul.f32 1.442695, %v1401_v39  ;;  %1800 = vpow2.f32 %v1434_v31  ;;  %v1444_v45 = vmul.f32 1.442695, %v1402_v41 }
 0x20e   :  { %v1793_v58 = vpop.eup %1792  ;;  %v1446_v34 = vmul.f32 1.442695, %v1403_v48  ;;  %v1406_v31 = vsub.f32 %v2310_v57, %v1380_v26  ;;  %v1448_v39 = vmul.f32 1.442695, %v1404_v55 }
 0x20f   :  { %v1488_v35 = vadd.f32 %v1793_v58, %v1791_v47  ;;  %1802 = vpow2.f32 %v1440_v50  ;;  %v1795_v27 = vpop.eup %1794 }
 0x210   :  { %1804 = vpow2.f32 %v1442_v10  ;;  %v1797_v13 = vpop.eup %1796 }
 0x211   :  { %1806 = vpow2.f32 %v1436_v52  ;;  %v1489_v38 = vadd.f32 %v1795_v27, %v1488_v35  ;;  %v1407_v27 = vsub.f32 %v2318_v2, %v1380_v26  ;;  %v1450_v35 = vmul.f32 1.442695, %v1405_v20 }
 0x212   :  { %v2456_v7 = vpop.permute.xlu2 %1561  ;;  %1808 = vpow2.f32 %v1444_v45  ;;  %v1799_v41 = vpop.eup %1798  ;;  %v2468_v52 = vadd.s32 384, %v2444_v59 }
 0x213   :  { %1810 = vpow2.f32 %v1438_v1  ;;  %v1490_v47 = vadd.f32 %v1797_v13, %v1489_v38  ;;  %vm1572_vm1 = vcmp.eq.s32.totalorder %v2444_v59, %v2456_v7  ;;  %vm1573_vm2 = vcmp.eq.s32.totalorder %v2453_v37, %v2456_v7  ;;  %v1801_v10 = vpop.eup %1800 }
 0x214   :  { %1812 = vpow2.f32 %v1446_v34  ;;  %v1452_v1 = vmul.f32 1.442695, %v1406_v31  ;;  %v1604_v55 = vsel %vm1572_vm1, %v2190_v46, 0.0  ;;  %v1605_v45 = vsel %vm1573_vm2, %v2197_v54, 0.0 }
 0x215   :  { %v1803_v48 = vpop.eup %1802  ;;  %v1491_v50 = vadd.f32 %v1799_v41, %v1490_v47  ;;  %1814 = vpow2.f32 %v1448_v39  ;;  %vm1574_vm3 = vcmp.eq.s32.totalorder %v2460_v23, %v2456_v7  ;;  %v1454_v26 = vmul.f32 1.442695, %v1407_v27 }
 0x216   :  { %v1805_v58 = vpop.eup %1804  ;;  %1816 = vpow2.f32 %v1450_v35  ;;  %vm1575_vm4 = vcmp.eq.s32.totalorder %v2468_v52, %v2456_v7  ;;  %v1636_v46 = vadd.f32 %v1605_v45, %v1604_v55  ;;  %v2482_v47 = vadd.s32 640, %v2444_v59 }
 0x217   :  { %v1807_v38 = vpop.eup %1806  ;;  %v1492_v13 = vadd.f32 %v1801_v10, %v1491_v50  ;;  %v1497_v29 = vadd.f32 %v1805_v58, %v1803_v48  ;;  %1818 = vpow2.f32 %v1452_v1  ;;  %v1606_v10 = vsel %vm1574_vm3, %v2226_v14, 0.0 }
 0x218   :  { %v1809_v34 = vpop.eup %1808  ;;  %vm1576_vm5 = vcmp.eq.s32.totalorder %v2473_v25, %v2456_v7  ;;  %v1637_v27 = vadd.f32 %v1636_v46, %v1606_v10  ;;  %1820 = vpow2.f32 %v1454_v26  ;;  %v1607_v35 = vsel %vm1575_vm4, %v2230_v18, 0.0 }
 0x219   :  { %v1811_v20 = vpop.eup %1810  ;;  %v1493_v41 = vadd.f32 %v1807_v38, %v1492_v13  ;;  %v1498_v39 = vadd.f32 %v1809_v34, %v1497_v29  ;;  %v2489_v1 = vadd.s32 768, %v2444_v59  ;;  %vm1577_vm6 = vcmp.eq.s32.totalorder %v2482_v47, %v2456_v7 }
 0x21a   :  { %v1813_v54 = vpop.eup %1812  ;;  %v2479_v31 = vpop.permute.xlu2 %1564  ;;  %v1638_v55 = vadd.f32 %v1637_v27, %v1607_v35  ;;  %v1608_v14 = vsel %vm1576_vm5, %v2258_v51, 0.0  ;;  %v1609_v26 = vsel %vm1577_vm6, %v2262_v56, 0.0 }
 0x21b   :  { %v1494_v48 = vadd.f32 %v1811_v20, %v1493_v41  ;;  %v1499_v50 = vadd.f32 %v1813_v54, %v1498_v39  ;;  %v1815_v29 = vpop.eup %1814  ;;  %v2496_v39 = vadd.s32 896, %v2444_v59  ;;  %vm1578_vm7 = vcmp.eq.s32.totalorder %v2489_v1, %v2456_v7 }
 0x21c   :  { %v1817_v45 = vpop.eup %1816  ;;  %v1639_v13 = vadd.f32 %v1638_v55, %v1608_v14  ;;  %v1610_v51 = vsel %vm1578_vm7, %v2294_v33, 0.0  ;;  %vm1580_vm1 = vcmp.eq.s32.totalorder %v2444_v59, %v2479_v31  ;;  %vm1581_vm3 = vcmp.eq.s32.totalorder %v2453_v37, %v2479_v31 }
 0x21d   :  { %1495 = vadd.xlane.f32.xlu1 %v1494_v48  ;;  %v1500_v58 = vadd.f32 %v1815_v29, %v1499_v50  ;;  %v1819_v34 = vpop.eup %1818  ;;  %vm1579_vm11 = vcmp.eq.s32.totalorder %v2496_v39, %v2456_v7  ;;  %vm1582_vm6 = vcmp.eq.s32.totalorder %v2460_v23, %v2479_v31 }
 0x21e   :  { %v1821_v41 = vpop.eup %1820  ;;  %v1640_v46 = vadd.f32 %v1639_v13, %v1609_v26  ;;  %v1611_v29 = vsel %vm1579_vm11, %v2302_v43, 0.0 }
 0x21f   :  { %v1501_v38 = vadd.f32 %v1817_v45, %v1500_v58 }
 0x220   :  { %v1641_v10 = vadd.f32 %v1640_v46, %v1610_v51 }
 0x221   :  { %v1502_v20 = vadd.f32 %v1819_v34, %v1501_v38 }
 0x222   :  { %v1568_v18 = vpop.permute.xlu2 %1567  ;;  %v1642_v58 = vadd.f32 %v1641_v10, %v1611_v29  ;;  %v1612_v10 = vsel %vm1580_vm1, %v2200_v53, 0.0  ;;  %v1613_v29 = vsel %vm1581_vm3, %v2206_v19, 0.0  ;;  %vm1586_vm1 = vcmp.eq.s32.totalorder %v2489_v1, %v2479_v31 }
 0x223   :  { %v1503_v54 = vadd.f32 %v1821_v41, %v1502_v20  ;;  %vm1588_vm8 = vcmp.eq.s32.totalorder %v2444_v59, %v1568_v18  ;;  %vm1589_vm9 = vcmp.eq.s32.totalorder %v2453_v37, %v1568_v18  ;;  %vm1590_vm10 = vcmp.eq.s32.totalorder %v2460_v23, %v1568_v18 }
 0x224   :  { %v1620_v56 = vsel %vm1588_vm8, %v2210_v61, 0.0  ;;  %v1621_v48 = vsel %vm1589_vm9, %v2214_v3, 0.0  ;;  %vm1591_vm12 = vcmp.eq.s32.totalorder %v2468_v52, %v1568_v18  ;;  %v1622_v27 = vsel %vm1590_vm10, %v2242_v32, 0.0 }
 0x225   :  { %1504 = vadd.xlane.f32.xlu2 %v1503_v54  ;;  %v1654_v50 = vadd.f32 %v1621_v48, %v1620_v56  ;;  %vm1592_vm13 = vcmp.eq.s32.totalorder %v2473_v25, %v1568_v18  ;;  %vm1593_vm14 = vcmp.eq.s32.totalorder %v2482_v47, %v1568_v18  ;;  %v1623_v55 = vsel %vm1591_vm12, %v2246_v36, 0.0 }
 0x226   :  { %vm1594_vm15 = vcmp.eq.s32.totalorder %v2489_v1, %v1568_v18  ;;  %v1624_v43 = vsel %vm1592_vm13, %v2274_v6, 0.0  ;;  %v1625_v46 = vsel %vm1593_vm14, %v2278_v11, 0.0  ;;  %vm1595_vm2 = vcmp.eq.s32.totalorder %v2496_v39, %v1568_v18 }
 0x227   :  { %v1655_v33 = vadd.f32 %v1654_v50, %v1622_v27  ;;  %v1627_v50 = vsel %vm1595_vm2, %v2334_v30, 0.0  ;;  %vm1583_vm9 = vcmp.eq.s32.totalorder %v2468_v52, %v2479_v31  ;;  %vm1584_vm12 = vcmp.eq.s32.totalorder %v2473_v25, %v2479_v31 }
 0x228   :  { %vm1585_vm14 = vcmp.eq.s32.totalorder %v2482_v47, %v2479_v31  ;;  %vm1587_vm2 = vcmp.eq.s32.totalorder %v2496_v39, %v2479_v31  ;;  %vm1707_vm3 = vcmp.ge.s32.totalorder %v2398_v15, 0  ;;  %v2679_v15 = vld [vmem:[#allocation9_spill] sm:$0xff] }
 0x229   :  { %v1656_v14 = vadd.f32 %v1655_v33, %v1623_v55 }
 0x22a   :  { %v1385_v35 = vpop.permute.xlu0 %1384  ;;  %v2531_v54 = vpop.permute.xlu2 %1570 }
 0x22b   :  { %v1408_v7 = vsub.f32 %v2210_v61, %v1385_v35  ;;  %v1409_v45 = vsub.f32 %v2214_v3, %v1385_v35  ;;  %v1410_v38 = vsub.f32 %v2242_v32, %v1385_v35  ;;  %v1411_v13 = vsub.f32 %v2246_v36, %v1385_v35 }
 0x22c   :  { %v1657_v26 = vadd.f32 %v1656_v14, %v1624_v43  ;;  %v1412_v41 = vsub.f32 %v2274_v6, %v1385_v35  ;;  %v1413_v61 = vsub.f32 %v2278_v11, %v1385_v35  ;;  %v1626_v36 = vsel %vm1594_vm15, %v2326_v17, 0.0 }
 0x22d   :  { %v1456_v34 = vmul.f32 1.442695, %v1408_v7  ;;  %v1458_v20 = vmul.f32 1.442695, %v1409_v45  ;;  %1643 = vadd.xlane.f32.xlu2 %v1642_v58  ;;  %v1460_v3 = vmul.f32 1.442695, %v1410_v38  ;;  %v1414_v51 = vsub.f32 %v2326_v17, %v1385_v35 }
 0x22e   :  { %v1658_v32 = vadd.f32 %v1657_v26, %v1625_v46  ;;  %v1462_v6 = vmul.f32 1.442695, %v1411_v13  ;;  %v1464_v56 = vmul.f32 1.442695, %v1412_v41  ;;  %v1466_v27 = vmul.f32 1.442695, %v1413_v61 }
 0x22f   :  { %1822 = vpow2.f32 %v1456_v34  ;;  %v1415_v17 = vsub.f32 %v2334_v30, %v1385_v35  ;;  %vm1596_vm4 = vcmp.eq.s32.totalorder %v2444_v59, %v2531_v54  ;;  %v1468_v14 = vmul.f32 1.442695, %v1414_v51 }
 0x230   :  { %1824 = vpow2.f32 %v1458_v20  ;;  %v1659_v11 = vadd.f32 %v1658_v32, %v1626_v36  ;;  %vm1597_vm5 = vcmp.eq.s32.totalorder %v2453_v37, %v2531_v54  ;;  %v1645_v41 = vadd.f32 %v1613_v29, %v1612_v10 }
 0x231   :  { %1826 = vpow2.f32 %v1460_v3  ;;  %v1470_v43 = vmul.f32 1.442695, %v1415_v17  ;;  %v1628_v37 = vsel %vm1596_vm4, %v2217_v4, 0.0  ;;  %v1629_v61 = vsel %vm1597_vm5, %v2222_v8, 0.0 }
 0x232   :  { %v2535_v48 = vpop.permute.xlu1 %1389  ;;  %v1660_v58 = vadd.f32 %v1659_v11, %v1627_v50  ;;  %1828 = vpow2.f32 %v1462_v6  ;;  %vm1598_vm7 = vcmp.eq.s32.totalorder %v2460_v23, %v2531_v54  ;;  %vm1599_vm8 = vcmp.eq.s32.totalorder %v2468_v52, %v2531_v54 }
 0x233   :  { %v1416_v18 = vsub.f32 %v2217_v4, %v2535_v48  ;;  %v1417_v33 = vsub.f32 %v2222_v8, %v2535_v48  ;;  %v1418_v53 = vsub.f32 %v2250_v40, %v2535_v48  ;;  %v1419_v55 = vsub.f32 %v2254_v42, %v2535_v48 }
 0x234   :  { %1830 = vpow2.f32 %v1464_v56  ;;  %v1420_v30 = vsub.f32 %v2282_v16, %v2535_v48  ;;  %v1421_v20 = vsub.f32 %v2286_v21, %v2535_v48  ;;  %v1422_v32 = vsub.f32 %v2342_v44, %v2535_v48 }
 0x235   :  { %v1823_v19 = vpop.eup %1822  ;;  %v1472_v7 = vmul.f32 1.442695, %v1416_v18  ;;  %v1474_v45 = vmul.f32 1.442695, %v1417_v33  ;;  %1661 = vadd.xlane.f32.xlu2 %v1660_v58  ;;  %1832 = vpow2.f32 %v1466_v27  ;;  %v1476_v35 = vmul.f32 1.442695, %v1418_v53 }
 0x236   :  { %v1825_v38 = vpop.eup %1824  ;;  %v1478_v26 = vmul.f32 1.442695, %v1419_v55  ;;  %v1480_v36 = vmul.f32 1.442695, %v1420_v30  ;;  %v1614_v4 = vsel %vm1582_vm6, %v2234_v24, 0.0  ;;  %v1423_v59 = vsub.f32 %v2348_v49, %v2535_v48 }
 0x237   :  { %v1506_v13 = vadd.f32 %v1825_v38, %v1823_v19  ;;  %1834 = vpow2.f32 %v1472_v7  ;;  %v1827_v34 = vpop.eup %1826  ;;  %v1482_v51 = vmul.f32 1.442695, %v1421_v20  ;;  %v1663_v56 = vadd.f32 %v1629_v61, %v1628_v37 }
 0x238   :  { %1836 = vpow2.f32 %v1474_v45  ;;  %v1829_v3 = vpop.eup %1828  ;;  %v1630_v27 = vsel %vm1598_vm7, %v2250_v40, 0.0  ;;  %v1646_v29 = vadd.f32 %v1645_v41, %v1614_v4  ;;  %v1484_v33 = vmul.f32 1.442695, %v1422_v32 }
 0x239   :  { %1838 = vpow2.f32 %v1468_v14  ;;  %v1507_v46 = vadd.f32 %v1827_v34, %v1506_v13  ;;  %vm1600_vm10 = vcmp.eq.s32.totalorder %v2473_v25, %v2531_v54  ;;  %v1664_v24 = vadd.f32 %v1663_v56, %v1630_v27  ;;  %v1353_v56 = vld [vmem:[#allocation3 + $0x8] sm:$0xff] }
 0x23a   :  { %1840 = vpow2.f32 %v1476_v35  ;;  %v1831_v6 = vpop.eup %1830  ;;  %v1631_v17 = vsel %vm1599_vm8, %v2254_v42, 0.0  ;;  %v1486_v53 = vmul.f32 1.442695, %v1423_v59  ;;  %vm1601_vm11 = vcmp.eq.s32.totalorder %v2482_v47, %v2531_v54 }
 0x23b   :  { %1842 = vpow2.f32 %v1470_v43  ;;  %v1508_v11 = vadd.f32 %v1829_v3, %v1507_v46  ;;  %v1833_v8 = vpop.eup %1832  ;;  %v1665_v55 = vadd.f32 %v1664_v24, %v1631_v17  ;;  %v1632_v14 = vsel %vm1600_vm10, %v2282_v16, 0.0  ;;  %v1683_v24 = vld [vmem:[#allocation2] sm:$0xff] }
 0x23c   :  { %1844 = vpow2.f32 %v1478_v26  ;;  %v1615_v38 = vsel %vm1583_vm9, %v2238_v28, 0.0  ;;  %vm1602_vm13 = vcmp.eq.s32.totalorder %v2489_v1, %v2531_v54  ;;  %v1633_v34 = vsel %vm1601_vm11, %v2286_v21, 0.0  ;;  %v1352_v1 = vld [vmem:[#allocation3] sm:$0xff] }
 0x23d   :  { %v1835_v10 = vpop.eup %1834  ;;  %v1509_v50 = vadd.f32 %v1831_v6, %v1508_v11  ;;  %1846 = vpow2.f32 %v1480_v36  ;;  %v1666_v42 = vadd.f32 %v1665_v55, %v1632_v14  ;;  %v1647_v35 = vadd.f32 %v1646_v29, %v1615_v38  ;;  %v2680_v14 = vld [vmem:[#allocation11_spill] sm:$0xff] }
 0x23e   :  { %v1837_v18 = vpop.eup %1836  ;;  %1848 = vpow2.f32 %v1482_v51  ;;  %v1634_v26 = vsel %vm1602_vm13, %v2342_v44, 0.0  ;;  %v1616_v25 = vsel %vm1584_vm12, %v2266_v60, 0.0  ;;  %vm1603_vm15 = vcmp.eq.s32.totalorder %v2496_v39, %v2531_v54 }
 0x23f   :  { %v1839_v23 = vpop.eup %1838  ;;  %v1510_v48 = vadd.f32 %v1833_v8, %v1509_v50  ;;  %v1515_v58 = vadd.f32 %v1837_v18, %v1835_v10  ;;  %1850 = vpow2.f32 %v1484_v33  ;;  %v1667_v20 = vadd.f32 %v1666_v42, %v1633_v34  ;;  %v1558_v33 = vld [vmem:[#allocation4 + $0x10] sm:$0xff]  ;;  %v1355_v34 = vld [vmem:[#allocation3 + $0x18] sm:$0xff] }
 0x240   :  { %v1841_v40 = vpop.eup %1840  ;;  %1852 = vpow2.f32 %v1486_v53  ;;  %v1648_v37 = vadd.f32 %v1647_v35, %v1616_v25  ;;  %v1635_v32 = vsel %vm1603_vm15, %v2348_v49, 0.0  ;;  %v1617_v36 = vsel %vm1585_vm14, %v2270_v0, 0.0 }
 0x241   :  { %v1843_v19 = vpop.eup %1842  ;;  %v1511_v7 = vadd.f32 %v1839_v23, %v1510_v48  ;;  %v1516_v45 = vadd.f32 %v1841_v40, %v1515_v58  ;;  %v1668_v46 = vadd.f32 %v1667_v20, %v1634_v26  ;;  %v1618_v60 = vsel %vm1586_vm1, %v2310_v57, 0.0 }
 0x242   :  { %v1845_v30 = vpop.eup %1844  ;;  %v1649_v47 = vadd.f32 %v1648_v37, %v1617_v36  ;;  %v1619_v11 = vsel %vm1587_vm2, %v2318_v2, 0.0  ;;  %v2675_v0 = vsub.f32 %v2373_v62, %v2376_v63  ;;  %v2676_v2 = vsub.f32 %v2383_v5, %v2386_v9  ;;  %v1556_v63 = vld [vmem:[#allocation4] sm:$0xff]  ;;  %v1557_v37 = vld [vmem:[#allocation4 + $0x8] sm:$0xff]  ;;  %v2682_v36 = vld [vmem:[#allocation12_spill] sm:$0xff] }
 0x243   :  { %v1512_v43 = vadd.f32 %v1843_v19, %v1511_v7  ;;  %v1517_v13 = vadd.f32 %v1845_v30, %v1516_v45  ;;  %v1847_v16 = vpop.eup %1846  ;;  %v1669_v44 = vadd.f32 %v1668_v46, %v1635_v32  ;;  %v2677_v17 = vsub.f32 %v2393_v12, %v2401_v22  ;;  %v1354_v12 = vld [vmem:[#allocation3 + $0x10] sm:$0xff] }
 0x244   :  { %v1849_v28 = vpop.eup %1848  ;;  %v1650_v54 = vadd.f32 %v1649_v47, %v1618_v60  ;;  %v1360_v57 = vmul.f32 1.442695, %v2675_v0  ;;  %v1362_v49 = vmul.f32 1.442695, %v2676_v2  ;;  %v2678_v53 = vmov 0.0   ;;  %v1685_v47 = vld [vmem:[#allocation2 + $0x10] sm:$0xff] }
 0x245   :  { %1513 = vadd.xlane.f32.xlu0 %v1512_v43  ;;  %v1518_v52 = vadd.f32 %v1847_v16, %v1517_v13  ;;  %v1851_v21 = vpop.eup %1850  ;;  %v1364_v40 = vmul.f32 1.442695, %v2677_v17  ;;  %v1773_v55 = vsel %vm1707_vm3, 1.0, %v2678_v53  ;;  %v2681_v38 = vsub.f32 %v2679_v15, %v2680_v14  ;;  %v1559_v16 = vld [vmem:[#allocation4 + $0x18] sm:$0xff]  ;;  %v1684_v2 = vld [vmem:[#allocation2 + $0x8] sm:$0xff] }
 0x246   :  { %v1853_v3 = vpop.eup %1852  ;;  %v1651_v4 = vadd.f32 %v1650_v54, %v1619_v11  ;;  %1854 = vpow2.f32 %v1360_v57  ;;  %vm1709_vm4 = vcmp.ge.s32.totalorder %v2682_v36, 0  ;;  %v2683_v57 = vld [vmem:[#allocation10_spill] sm:$0xff] }
 0x247   :  { %v1519_v41 = vadd.f32 %v1849_v28, %v1518_v52  ;;  %1856 = vpow2.f32 %v1362_v49  ;;  %v1366_v30 = vmul.f32 1.442695, %v2681_v38  ;;  %vm1708_vm5 = vcmp.ge.s32.totalorder %v2683_v57, 0 }
 0x249   :  { %v1520_v61 = vadd.f32 %v1851_v21, %v1519_v41 }
 0x24b   :  { %v1521_v6 = vadd.f32 %v1853_v3, %v1520_v61 }
 0x24c   :  { %v1855_v31 = vpop.eup %1854 }
 0x24d   :  { %1522 = vadd.xlane.f32.xlu1 %v1521_v6  ;;  %1670 = vadd.xlane.f32.xlu0 %v1669_v44  ;;  %v1368_v39 = vmul.f32 %v1855_v31, %v1352_v1  ;;  %v1857_v51 = vpop.eup %1856 }
 0x24e   :  { %v1369_v10 = vmul.f32 %v1857_v51, %v1353_v56  ;;  %v1686_v56 = vld [vmem:[#allocation2 + $0x18] sm:$0xff] }
 0x255   :  { %1652 = vadd.xlane.f32.xlu1 %v1651_v4  ;;  %v1775_v4 = vsel %vm1709_vm4, 1.0, %v2678_v53 }
 0x290   :  { %v1496_v8 = vpop.xlane.xlu1 %1495 }
 0x291   :  { %v1524_v59 = vadd.f32 %v1496_v8, %v1368_v39  ;;  %v2684_v8 = vld [vmem:[#allocation13_spill] sm:$0xff] }
 0x292   :  { %vm1710_vm6 = vcmp.ge.s32.totalorder %v2684_v8, 0 }
 0x293   :  { %1529 = vst.msk [vmem:[#allocation3] sm:$0xff] %vm27_vm0, %v1524_v59  ;;  %v1774_v59 = vsel %vm1708_vm5, 1.0, %v2678_v53 }
 0x298   :  { %v1505_v50 = vpop.xlane.xlu2 %1504 }
 0x299   :  { %v1525_v27 = vadd.f32 %v1505_v50, %v1369_v10 }
 0x29a   :  { %v1687_v62 = vld [vmem:[#allocation3] sm:$0xff] }
 0x29b   :  { %1530 = vst.msk [vmem:[#allocation3 + $0x8] sm:$0xff] %vm27_vm0, %v1525_v27  ;;  %1858 = vlog2.f32 %v1687_v62  ;;  %v1776_v27 = vsel %vm1710_vm6, 1.0, %v2678_v53 }
 0x29c   :  { %1860 = vpow2.f32 %v1364_v40 }
 0x29d   :  { %1862 = vpow2.f32 %v1366_v30 }
 0x2a0   :  { %v1644_v5 = vpop.xlane.xlu2 %1643 }
 0x2a1   :  { %v1672_v9 = vadd.f32 %v1644_v5, %v1556_v63  ;;  %v1859_v29 = vpop.eup %1858 }
 0x2a2   :  { %v1692_v18 = vmul.f32 0.6931472, %v1859_v29  ;;  %v1861_v42 = vpop.eup %1860  ;;  %v1688_v26 = vld [vmem:[#allocation3 + $0x8] sm:$0xff] }
 0x2a3   :  { %1676 = vst.msk [vmem:[#allocation4] sm:$0xff] %vm27_vm0, %v1672_v9  ;;  %v1370_v22 = vmul.f32 %v1861_v42, %v1354_v12  ;;  %v1863_v13 = vpop.eup %1862 }
 0x2a4   :  { %v1699_v48 = vadd.f32 %v1692_v18, %v1683_v24  ;;  %v1371_v20 = vmul.f32 %v1863_v13, %v1355_v34 }
 0x2a8   :  { %v1662_v23 = vpop.xlane.xlu2 %1661 }
 0x2a9   :  { %v1674_v58 = vadd.f32 %v1662_v23, %v1558_v33 }
 0x2aa   :  { %v1719_v19 = vld [vmem:[#allocation4] sm:$0xff] }
 0x2ab   :  { %v1723_v7 = vsub.f32 %v1699_v48, %v1719_v19  ;;  %1678 = vst.msk [vmem:[#allocation4 + $0x10] sm:$0xff] %vm27_vm0, %v1674_v58 }
 0x2ad   :  { %v1727_v45 = vmul.f32 %v1773_v55, %v1723_v7 }
 0x2af   :  { %1731 = vst.msk [vmem:[%s2662_s5] sm:$0xff] %vm27_vm0, %v1727_v45 }
 0x2b2   :  { %v1721_v11 = vld [vmem:[#allocation4 + $0x10] sm:$0xff] }
 0x2b8   :  { %v1514_v35 = vpop.xlane.xlu0 %1513 }
 0x2b9   :  { %v1526_v43 = vadd.f32 %v1514_v35, %v1370_v22 }
 0x2bb   :  { %1531 = vst.msk [vmem:[#allocation3 + $0x10] sm:$0xff] %vm27_vm0, %v1526_v43 }
 0x2c0   :  { %v1523_v52 = vpop.xlane.xlu1 %1522  ;;  %v1671_v28 = vpop.xlane.xlu0 %1670 }
 0x2c1   :  { %v1527_v25 = vadd.f32 %v1523_v52, %v1371_v20  ;;  %v1675_v41 = vadd.f32 %v1671_v28, %v1559_v16 }
 0x2c2   :  { %v1689_v46 = vld [vmem:[#allocation3 + $0x10] sm:$0xff] }
 0x2c3   :  { %1864 = vlog2.f32 %v1689_v46  ;;  %1532 = vst.msk [vmem:[#allocation3 + $0x18] sm:$0xff] %vm27_vm0, %v1527_v25 }
 0x2c4   :  { %1866 = vlog2.f32 %v1688_v26  ;;  %1679 = vst.msk [vmem:[#allocation4 + $0x18] sm:$0xff] %vm27_vm0, %v1675_v41 }
 0x2c8   :  { %v1653_v21 = vpop.xlane.xlu1 %1652 }
 0x2c9   :  { %v1865_v61 = vpop.eup %1864  ;;  %v1673_v3 = vadd.f32 %v1653_v21, %v1557_v37 }
 0x2ca   :  { %v1867_v32 = vpop.eup %1866  ;;  %v1696_v6 = vmul.f32 0.6931472, %v1865_v61  ;;  %v1690_v44 = vld [vmem:[#allocation3 + $0x18] sm:$0xff] }
 0x2cb   :  { %1868 = vlog2.f32 %v1690_v44  ;;  %1677 = vst.msk [vmem:[#allocation4 + $0x8] sm:$0xff] %vm27_vm0, %v1673_v3  ;;  %v1694_v54 = vmul.f32 0.6931472, %v1867_v32  ;;  %v1722_v62 = vld [vmem:[#allocation4 + $0x18] sm:$0xff] }
 0x2cc   :  { %v1701_v60 = vadd.f32 %v1696_v6, %v1685_v47 }
 0x2cd   :  { %v1700_v1 = vadd.f32 %v1694_v54, %v1684_v2 }
 0x2ce   :  { %v1725_v0 = vsub.f32 %v1701_v60, %v1721_v11 }
 0x2d0   :  { %v1729_v49 = vmul.f32 %v1775_v4, %v1725_v0 }
 0x2d1   :  { %v1869_v31 = vpop.eup %1868 }
 0x2d2   :  { %1733 = vst.msk [vmem:[%s2662_s5 + $0x10] sm:$0xff] %vm27_vm0, %v1729_v49  ;;  %v1698_v39 = vmul.f32 0.6931472, %v1869_v31  ;;  %v1720_v51 = vld [vmem:[#allocation4 + $0x8] sm:$0xff] }
 0x2d3   :  { %v1724_v10 = vsub.f32 %v1700_v1, %v1720_v51 }
 0x2d4   :  { %v1702_v50 = vadd.f32 %v1698_v39, %v1686_v56 }
 0x2d5   :  { %v1728_v63 = vmul.f32 %v1774_v59, %v1724_v10 }
 0x2d6   :  { %v1726_v5 = vsub.f32 %v1702_v50, %v1722_v62 }
 0x2d7   :  { %1732 = vst.msk [vmem:[%s2662_s5 + $0x8] sm:$0xff] %vm27_vm0, %v1728_v63 }
 0x2d8   :  { %v1730_v9 = vmul.f32 %v1776_v27, %v1726_v5 }
 0x2da   :  { %1734 = vst.msk [vmem:[%s2662_s5 + $0x18] sm:$0xff] %vm27_vm0, %v1730_v9 }
 0x2db   :  { %1894 = dma.done.wait [#allocation7], 4096  }
 0x2dc   :  { %1895 = vsyncadd [#allocation7], 4294963200 }
 0x2dd   :  { %1756 = vsyncpa [#allocation7], 1 }

</bundles_post_ra>
